<compile_context>
chip_gen: v6e
topology: v6e:2x2x1
jax: 0.10.0
libtpu: 0.0.40
codegen_flags: <defaults>
</compile_context>

<pallas_src>
import jax
import jax.numpy as jnp
from jax.experimental import pallas as pl
from jax.experimental.pallas import tpu as pltpu

# ----------------------------- model dimensions ------------------------------
STATE_DIM = 16     # state_dim
ACTION_DIM = 4     # action_dim
HIDDEN_DIM = 32    # hidden_dim
LSTM_LAYERS = 2    # lstm_layers (fixed to 2 in this kernel)
BATCH = 2
SEQ = 8
GATES = 4 * HIDDEN_DIM          # 128
OUT_LANES = 128                 # lane-dense packed output width

# ----------------------------- packed slab layout -----------------------------
# slab: (SLAB_ROWS, 128) f32; every block starts at a multiple of 8 rows.
_R_WIH0 = 0                                       # (STATE_DIM, 128) g-scaled W_ih0
_R_BIAS = ((STATE_DIM + 7) // 8) * 8              # 16: rows b0, b1, bh1, bh2, pad x4
_R_WH1 = _R_BIAS + 8                              # 24: (HIDDEN_DIM, 128) fused head W1
_R_WH2 = _R_WH1 + HIDDEN_DIM                      # 56: (128, 128) block-diag head W2
SLAB_ROWS = _R_WH2 + OUT_LANES                    # 184


# --------------------------------- kernel ------------------------------------
def _lstm_ac_kernel(x_ref, slab_ref, wrec_ref, out_ref):
    B, T, D = x_ref.shape
    H = HIDDEN_DIM
    G = GATES
    A = ACTION_DIM
    f32 = jnp.float32

    # ---- one-shot parameter slab slices (static, 8-row aligned) ----
    wih0 = slab_ref[_R_WIH0:_R_WIH0 + D, :]          # (D, 128), g-cols pre-scaled
    biases = slab_ref[_R_BIAS:_R_BIAS + 8, :]        # (8, 128)
    b0 = biases[0:1, :]
    b1 = biases[1:2, :]
    bh1 = biases[2:3, :]
    bh2 = biases[3:4, :]
    wh1 = slab_ref[_R_WH1:_R_WH1 + H, :]             # (32, 128) [wa1 | wc1 | 0]
    wh2 = slab_ref[_R_WH2:_R_WH2 + OUT_LANES, :]     # (128, 128) block-diag heads
    wrec = wrec_ref[...]                             # (64, 256) wavefront block matrix

    # ---- hoisted layer-0 input projection: one matmul for all time steps ----
    # Kept lane-dense as (B, T, 4H) = 2 dense vregs; no time-major relayout.
    x_flat = x_ref[...].reshape(B * T, D)
    xproj = (jnp.dot(x_flat, wih0, preferred_element_type=f32)
             + b0).reshape(B, T, G)

    # b1 broadcast hoisted out of the unrolled loop (JAX does not CSE it).
    b1b = jnp.broadcast_to(b1, (B, G))

    def cell(gates, c_prev):
        # Single EUP pass over all 4 gates.  The g-gate columns were pre-scaled
        # by 2 at pack time, so tanh(x) is recovered as 2*sigmoid(2x) - 1.
        sig = jax.nn.sigmoid(gates)
        i = sig[:, 0 * H:1 * H]
        f = sig[:, 1 * H:2 * H]
        g = 2.0 * sig[:, 2 * H:3 * H] - 1.0
        o = sig[:, 3 * H:4 * H]
        c_new = f * c_prev + i * g
        h_new = o * jnp.tanh(c_new)
        return h_new, c_new

    zero_h = jnp.zeros((B, H), f32)

    # t = 0, layer 0: h0_prev = 0 so gates0(0) = xproj(0) (bias already folded).
    h0, c0 = cell(xproj[:, 0, :], zero_h)
    h1, c1 = zero_h, zero_h

    # Wavefront recurrence: per step, one fused (B,64) @ (64,256) matmul gives
    #   left  half = h0(t) @ whh0                      -> layer-0 gates, step t+1
    #   right half = h0(t) @ wih1 + h1(t-1) @ whh1     -> layer-1 gates, step t
    for t in range(T):
        hcat = jnp.concatenate([h0, h1], axis=1)                     # (B, 2H)
        fused = jnp.dot(hcat, wrec, preferred_element_type=f32)      # (B, 2G)
        h1, c1 = cell(fused[:, G:2 * G] + b1b, c1)                   # layer 1, step t
        if t + 1 < T:
            h0, c0 = cell(xproj[:, t + 1, :] + fused[:, 0:G], c0)    # layer 0, step t+1

    feat = h1  # lstm_out[:, -1, :]

    # ---- fused actor + critic heads ----
    # hid lanes: [0:H) actor hidden, [H:2H) critic hidden, rest exactly 0.
    hid = jnp.maximum(jnp.dot(feat, wh1, preferred_element_type=f32) + bh1, 0.0)
    # y lanes: [0:A) actor pre-sigmoid, [A] value, rest 0  (lane-dense packed out).
    y = jnp.dot(hid, wh2, preferred_element_type=f32) + bh2
    lane = jax.lax.broadcasted_iota(jnp.int32, y.shape, 1)
    out_ref[...] = jnp.where(lane < A, jax.nn.sigmoid(y), y)


# -------------------------------- wrapper -------------------------------------
@jax.jit
def lstm_actor_critic_forward(x_btd, packed_params):
    """x_btd: (B, T, D) float32, PyTorch batch_first layout (no transpose needed).

    packed_params = (slab, wrec, log_std) from pack_params().
    Returns (action_mean (B,A), action_std (B,A), value (B,1))."""
    slab, wrec, logstd = packed_params
    B = x_btd.shape[0]
    A = ACTION_DIM

    vmem_spec = lambda: pl.BlockSpec(memory_space=pltpu.MemorySpace.VMEM)

    packed = pl.pallas_call(
        _lstm_ac_kernel,
        out_shape=jax.ShapeDtypeStruct((B, OUT_LANES), jnp.float32),
        in_specs=[vmem_spec(), vmem_spec(), vmem_spec()],
        out_specs=vmem_spec(),
    )(x_btd, slab, wrec)

    action_mean = packed[:, :A]
    value = packed[:, A:A + 1]
    # std = exp(log_std) is input-independent; compute outside the kernel.
    action_std = jnp.broadcast_to(jnp.exp(logstd), action_mean.shape)
    return action_mean, action_std, value


# ---------------------- deterministic parameter init --------------------------
def init_raw_params(key):
    H, D, A = HIDDEN_DIM, STATE_DIM, ACTION_DIM
    ks = jax.random.split(key, 16)

    def w(k, shape, scale=0.1):
        return (scale * jax.random.normal(k, shape)).astype(jnp.float32)

    wih0 = w(ks[0], (D, 4 * H))
    whh0 = w(ks[1], (H, 4 * H))
    b0 = w(ks[2], (1, 4 * H))        # b_ih + b_hh combined
    wih1 = w(ks[3], (H, 4 * H))
    whh1 = w(ks[4], (H, 4 * H))
    b1 = w(ks[5], (1, 4 * H))
    wa1 = w(ks[6], (H, H))
    ba1 = w(ks[7], (1, H))
    wa2 = w(ks[8], (H, A))
    ba2 = w(ks[9], (1, A))
    wc1 = w(ks[10], (H, H))
    bc1 = w(ks[11], (1, H))
    wc2 = w(ks[12], (H, 1))
    bc2 = w(ks[13], (1, 1))
    logstd = jnp.zeros((1, A), jnp.float32)   # nn.Parameter(torch.zeros(action_dim))
    return (wih0, whh0, b0, wih1, whh1, b1,
            wa1, ba1, wa2, ba2, wc1, bc1, wc2, bc2, logstd)


def pack_params(raw):
    """Pack the 15 raw parameter arrays into two contiguous f32 slabs
    (one (184,128) slab + one (64,256) wavefront block matrix) + log_std."""
    (wih0, whh0, b0, wih1, whh1, b1,
     wa1, ba1, wa2, ba2, wc1, bc1, wc2, bc2, logstd) = raw
    H, G, A, D = HIDDEN_DIM, GATES, ACTION_DIM, STATE_DIM

    def scale_g(m):  # pre-scale g-gate columns by 2:  tanh(x) = 2*sigmoid(2x) - 1
        return m.at[..., 2 * H:3 * H].multiply(2.0)

    wih0_s, whh0_s, b0_s = scale_g(wih0), scale_g(whh0), scale_g(b0)
    wih1_s, whh1_s, b1_s = scale_g(wih1), scale_g(whh1), scale_g(b1)

    # Wavefront block matrix: [h0(t) | h1(t-1)] @ [[whh0, wih1], [0, whh1]].
    wrec = jnp.concatenate([
        jnp.concatenate([whh0_s, wih1_s], axis=1),
        jnp.concatenate([jnp.zeros((H, G), jnp.float32), whh1_s], axis=1),
    ], axis=0).astype(jnp.float32)                                # (64, 256)

    # Fused actor/critic head weights (zero-padded to 128 lanes).
    wh1 = jnp.zeros((H, OUT_LANES), jnp.float32)
    wh1 = wh1.at[:, 0:H].set(wa1).at[:, H:2 * H].set(wc1)
    bh1 = jnp.zeros((1, OUT_LANES), jnp.float32)
    bh1 = bh1.at[:, 0:H].set(ba1).at[:, H:2 * H].set(bc1)
    wh2 = jnp.zeros((OUT_LANES, OUT_LANES), jnp.float32)
    wh2 = wh2.at[0:H, 0:A].set(wa2).at[H:2 * H, A:A + 1].set(wc2)
    bh2 = jnp.zeros((1, OUT_LANES), jnp.float32)
    bh2 = bh2.at[:, 0:A].set(ba2).at[:, A:A + 1].set(bc2)

    slab = jnp.zeros((SLAB_ROWS, OUT_LANES), jnp.float32)
    slab = slab.at[_R_WIH0:_R_WIH0 + D, :].set(wih0_s)
    slab = slab.at[_R_BIAS + 0, :].set(b0_s[0])
    slab = slab.at[_R_BIAS + 1, :].set(b1_s[0])
    slab = slab.at[_R_BIAS + 2, :].set(bh1[0])
    slab = slab.at[_R_BIAS + 3, :].set(bh2[0])
    slab = slab.at[_R_WH1:_R_WH1 + H, :].set(wh1)
    slab = slab.at[_R_WH2:_R_WH2 + OUT_LANES, :].set(wh2)
    return slab, wrec, logstd


# ------------------------------- pure-JAX ref ----------------------------------
def ref_forward(x_btd, raw_params):
    (wih0, whh0, b0, wih1, whh1, b1,
     wa1, ba1, wa2, ba2, wc1, bc1, wc2, bc2, logstd) = raw_params
    B, T, D = x_btd.shape
    H = HIDDEN_DIM

    def cell(inp, h, c, wih, whh, b):
        g = inp @ wih + h @ whh + b
        i = jax.nn.sigmoid(g[:, 0 * H:1 * H])
        f = jax.nn.sigmoid(g[:, 1 * H:2 * H])
        gg = jnp.tanh(g[:, 2 * H:3 * H])
        o = jax.nn.sigmoid(g[:, 3 * H:4 * H])
        c = f * c + i * gg
        h = o * jnp.tanh(c)
        return h, c

    h = [jnp.zeros((B, H)), jnp.zeros((B, H))]
    c = [jnp.zeros((B, H)), jnp.zeros((B, H))]
    for t in range(T):
        inp = x_btd[:, t, :]
        h[0], c[0] = cell(inp, h[0], c[0], wih0, whh0, b0)
        h[1], c[1] = cell(h[0], h[1], c[1], wih1, whh1, b1)
    feat = h[1]
    a_hid = jnp.maximum(feat @ wa1 + ba1, 0.0)
    mean = jax.nn.sigmoid(a_hid @ wa2 + ba2)
    c_hid = jnp.maximum(feat @ wc1 + bc1, 0.0)
    val = c_hid @ wc2 + bc2
    std = jnp.exp(jnp.broadcast_to(logstd, mean.shape))
    return mean, std, val


# ----------------------------------- main ---------------------------------------
if __name__ == "__main__":
    key = jax.random.PRNGKey(0)
    kx, kp = jax.random.split(key)
    x = jax.random.normal(kx, (BATCH, SEQ, STATE_DIM), dtype=jnp.float32)

    raw_params = init_raw_params(kp)
    packed_params = pack_params(raw_params)   # one-time packing, off the hot path

    mean, std, value = lstm_actor_critic_forward(x, packed_params)
    jax.block_until_ready((mean, std, value))

    ref_mean, ref_std, ref_val = ref_forward(x, raw_params)
    assert mean.shape == (BATCH, ACTION_DIM)
    assert std.shape == (BATCH, ACTION_DIM)
    assert value.shape == (BATCH, 1)
    assert jnp.allclose(mean, ref_mean, atol=1e-4, rtol=1e-4), (
        float(jnp.max(jnp.abs(mean - ref_mean))))
    assert jnp.allclose(std, ref_std, atol=1e-5, rtol=1e-5)
    assert jnp.allclose(value, ref_val, atol=1e-4, rtol=1e-4), (
        float(jnp.max(jnp.abs(value - ref_val))))

    print("KERNEL_OK")
</pallas_src>

<mosaic_0001>
module attributes {stable_mosaic.version = 11 : i64} {
  func.func @_lstm_ac_kernel(%arg0: memref<2x8x16xf32, #tpu.memory_space<vmem>>, %arg1: memref<184x128xf32, #tpu.memory_space<vmem>>, %arg2: memref<64x256xf32, #tpu.memory_space<vmem>>, %arg3: memref<2x128xf32, #tpu.memory_space<vmem>>) attributes {dimension_semantics = [], scalar_prefetch = 0 : i64, scratch_operands = 0 : i64, tpu.core_type = #tpu.core_type<tc>} {
    %c0 = arith.constant 0 : index
    %c0_0 = arith.constant 0 : index
    %0 = vector.load %arg1[%c0, %c0_0] : memref<184x128xf32, #tpu.memory_space<vmem>>, vector<16x128xf32>
    %c16 = arith.constant 16 : index
    %c0_1 = arith.constant 0 : index
    %1 = vector.load %arg1[%c16, %c0_1] : memref<184x128xf32, #tpu.memory_space<vmem>>, vector<8x128xf32>
    %2 = vector.extract_strided_slice %1 {offsets = [0, 0], sizes = [1, 128], strides = [1, 1]} : vector<8x128xf32> to vector<1x128xf32>
    %3 = vector.extract_strided_slice %1 {offsets = [1, 0], sizes = [1, 128], strides = [1, 1]} : vector<8x128xf32> to vector<1x128xf32>
    %4 = vector.extract_strided_slice %1 {offsets = [2, 0], sizes = [1, 128], strides = [1, 1]} : vector<8x128xf32> to vector<1x128xf32>
    %5 = vector.extract_strided_slice %1 {offsets = [3, 0], sizes = [1, 128], strides = [1, 1]} : vector<8x128xf32> to vector<1x128xf32>
    %c24 = arith.constant 24 : index
    %c0_2 = arith.constant 0 : index
    %6 = vector.load %arg1[%c24, %c0_2] : memref<184x128xf32, #tpu.memory_space<vmem>>, vector<32x128xf32>
    %c56 = arith.constant 56 : index
    %c0_3 = arith.constant 0 : index
    %7 = vector.load %arg1[%c56, %c0_3] : memref<184x128xf32, #tpu.memory_space<vmem>>, vector<128x128xf32>
    %c0_4 = arith.constant 0 : index
    %c0_5 = arith.constant 0 : index
    %8 = vector.load %arg2[%c0_4, %c0_5] : memref<64x256xf32, #tpu.memory_space<vmem>>, vector<64x256xf32>
    %c0_6 = arith.constant 0 : index
    %c0_7 = arith.constant 0 : index
    %c0_8 = arith.constant 0 : index
    %9 = vector.load %arg0[%c0_6, %c0_7, %c0_8] : memref<2x8x16xf32, #tpu.memory_space<vmem>>, vector<2x8x16xf32>
    %10 = vector.shape_cast %9 : vector<2x8x16xf32> to vector<16x16xf32>
    %cst = arith.constant dense<0.000000e+00> : vector<16x128xf32>
    %11 = tpu.matmul %10, %0, %cst {dimension_numbers = #tpu.dot_dimension_numbers<[1], [0], [0], [1], [0, 0, 1, 1], [], []>} : vector<16x16xf32>, vector<16x128xf32>, vector<16x128xf32> -> vector<16x128xf32>
    %12 = vector.broadcast %2 : vector<1x128xf32> to vector<16x128xf32>
    %13 = arith.addf %11, %12 : vector<16x128xf32>
    %14 = vector.shape_cast %13 : vector<16x128xf32> to vector<2x8x128xf32>
    %15 = vector.shape_cast %3 : vector<1x128xf32> to vector<1x128xf32>
    %16 = vector.broadcast %15 : vector<1x128xf32> to vector<2x128xf32>
    %cst_9 = arith.constant 0.000000e+00 : f32
    %17 = vector.broadcast %cst_9 : f32 to vector<2x32xf32>
    %18 = vector.extract_strided_slice %14 {offsets = [0, 0, 0], sizes = [2, 1, 128], strides = [1, 1, 1]} : vector<2x8x128xf32> to vector<2x1x128xf32>
    %19 = vector.shape_cast %18 : vector<2x1x128xf32> to vector<2x128xf32>
    %20 = arith.negf %19 : vector<2x128xf32>
    %21 = math.exp %20 : vector<2x128xf32>
    %cst_10 = arith.constant 1.000000e+00 : f32
    %22 = vector.broadcast %cst_10 : f32 to vector<2x128xf32>
    %23 = arith.addf %22, %21 : vector<2x128xf32>
    %24 = arith.divf %22, %23 : vector<2x128xf32>
    %25 = vector.extract_strided_slice %24 {offsets = [0, 0], sizes = [2, 32], strides = [1, 1]} : vector<2x128xf32> to vector<2x32xf32>
    %26 = vector.extract_strided_slice %24 {offsets = [0, 32], sizes = [2, 32], strides = [1, 1]} : vector<2x128xf32> to vector<2x32xf32>
    %27 = vector.extract_strided_slice %24 {offsets = [0, 64], sizes = [2, 32], strides = [1, 1]} : vector<2x128xf32> to vector<2x32xf32>
    %cst_11 = arith.constant 2.000000e+00 : f32
    %28 = vector.broadcast %cst_11 : f32 to vector<2x32xf32>
    %29 = arith.mulf %28, %27 : vector<2x32xf32>
    %cst_12 = arith.constant 1.000000e+00 : f32
    %30 = vector.broadcast %cst_12 : f32 to vector<2x32xf32>
    %31 = arith.subf %29, %30 : vector<2x32xf32>
    %32 = vector.extract_strided_slice %24 {offsets = [0, 96], sizes = [2, 32], strides = [1, 1]} : vector<2x128xf32> to vector<2x32xf32>
    %33 = arith.mulf %26, %17 : vector<2x32xf32>
    %34 = arith.mulf %25, %31 : vector<2x32xf32>
    %35 = arith.addf %33, %34 : vector<2x32xf32>
    %36 = math.tanh %35 : vector<2x32xf32>
    %37 = arith.mulf %32, %36 : vector<2x32xf32>
    %38 = tpu.concatenate %37, %17 in 1 : vector<2x32xf32>, vector<2x32xf32> -> vector<2x64xf32>
    %cst_13 = arith.constant dense<0.000000e+00> : vector<2x256xf32>
    %39 = tpu.matmul %38, %8, %cst_13 {dimension_numbers = #tpu.dot_dimension_numbers<[1], [0], [0], [1], [0, 0, 1, 1], [], []>} : vector<2x64xf32>, vector<64x256xf32>, vector<2x256xf32> -> vector<2x256xf32>
    %40 = vector.extract_strided_slice %39 {offsets = [0, 128], sizes = [2, 128], strides = [1, 1]} : vector<2x256xf32> to vector<2x128xf32>
    %41 = arith.addf %40, %16 : vector<2x128xf32>
    %42 = arith.negf %41 : vector<2x128xf32>
    %43 = math.exp %42 : vector<2x128xf32>
    %cst_14 = arith.constant 1.000000e+00 : f32
    %44 = vector.broadcast %cst_14 : f32 to vector<2x128xf32>
    %45 = arith.addf %44, %43 : vector<2x128xf32>
    %46 = arith.divf %44, %45 : vector<2x128xf32>
    %47 = vector.extract_strided_slice %46 {offsets = [0, 0], sizes = [2, 32], strides = [1, 1]} : vector<2x128xf32> to vector<2x32xf32>
    %48 = vector.extract_strided_slice %46 {offsets = [0, 32], sizes = [2, 32], strides = [1, 1]} : vector<2x128xf32> to vector<2x32xf32>
    %49 = vector.extract_strided_slice %46 {offsets = [0, 64], sizes = [2, 32], strides = [1, 1]} : vector<2x128xf32> to vector<2x32xf32>
    %cst_15 = arith.constant 2.000000e+00 : f32
    %50 = vector.broadcast %cst_15 : f32 to vector<2x32xf32>
    %51 = arith.mulf %50, %49 : vector<2x32xf32>
    %cst_16 = arith.constant 1.000000e+00 : f32
    %52 = vector.broadcast %cst_16 : f32 to vector<2x32xf32>
    %53 = arith.subf %51, %52 : vector<2x32xf32>
    %54 = vector.extract_strided_slice %46 {offsets = [0, 96], sizes = [2, 32], strides = [1, 1]} : vector<2x128xf32> to vector<2x32xf32>
    %55 = arith.mulf %48, %17 : vector<2x32xf32>
    %56 = arith.mulf %47, %53 : vector<2x32xf32>
    %57 = arith.addf %55, %56 : vector<2x32xf32>
    %58 = math.tanh %57 : vector<2x32xf32>
    %59 = arith.mulf %54, %58 : vector<2x32xf32>
    %60 = vector.extract_strided_slice %14 {offsets = [0, 1, 0], sizes = [2, 1, 128], strides = [1, 1, 1]} : vector<2x8x128xf32> to vector<2x1x128xf32>
    %61 = vector.shape_cast %60 : vector<2x1x128xf32> to vector<2x128xf32>
    %62 = vector.extract_strided_slice %39 {offsets = [0, 0], sizes = [2, 128], strides = [1, 1]} : vector<2x256xf32> to vector<2x128xf32>
    %63 = arith.addf %61, %62 : vector<2x128xf32>
    %64 = arith.negf %63 : vector<2x128xf32>
    %65 = math.exp %64 : vector<2x128xf32>
    %cst_17 = arith.constant 1.000000e+00 : f32
    %66 = vector.broadcast %cst_17 : f32 to vector<2x128xf32>
    %67 = arith.addf %66, %65 : vector<2x128xf32>
    %68 = arith.divf %66, %67 : vector<2x128xf32>
    %69 = vector.extract_strided_slice %68 {offsets = [0, 0], sizes = [2, 32], strides = [1, 1]} : vector<2x128xf32> to vector<2x32xf32>
    %70 = vector.extract_strided_slice %68 {offsets = [0, 32], sizes = [2, 32], strides = [1, 1]} : vector<2x128xf32> to vector<2x32xf32>
    %71 = vector.extract_strided_slice %68 {offsets = [0, 64], sizes = [2, 32], strides = [1, 1]} : vector<2x128xf32> to vector<2x32xf32>
    %cst_18 = arith.constant 2.000000e+00 : f32
    %72 = vector.broadcast %cst_18 : f32 to vector<2x32xf32>
    %73 = arith.mulf %72, %71 : vector<2x32xf32>
    %cst_19 = arith.constant 1.000000e+00 : f32
    %74 = vector.broadcast %cst_19 : f32 to vector<2x32xf32>
    %75 = arith.subf %73, %74 : vector<2x32xf32>
    %76 = vector.extract_strided_slice %68 {offsets = [0, 96], sizes = [2, 32], strides = [1, 1]} : vector<2x128xf32> to vector<2x32xf32>
    %77 = arith.mulf %70, %35 : vector<2x32xf32>
    %78 = arith.mulf %69, %75 : vector<2x32xf32>
    %79 = arith.addf %77, %78 : vector<2x32xf32>
    %80 = math.tanh %79 : vector<2x32xf32>
    %81 = arith.mulf %76, %80 : vector<2x32xf32>
    %82 = tpu.concatenate %81, %59 in 1 : vector<2x32xf32>, vector<2x32xf32> -> vector<2x64xf32>
    %cst_20 = arith.constant dense<0.000000e+00> : vector<2x256xf32>
    %83 = tpu.matmul %82, %8, %cst_20 {dimension_numbers = #tpu.dot_dimension_numbers<[1], [0], [0], [1], [0, 0, 1, 1], [], []>} : vector<2x64xf32>, vector<64x256xf32>, vector<2x256xf32> -> vector<2x256xf32>
    %84 = vector.extract_strided_slice %83 {offsets = [0, 128], sizes = [2, 128], strides = [1, 1]} : vector<2x256xf32> to vector<2x128xf32>
    %85 = arith.addf %84, %16 : vector<2x128xf32>
    %86 = arith.negf %85 : vector<2x128xf32>
    %87 = math.exp %86 : vector<2x128xf32>
    %cst_21 = arith.constant 1.000000e+00 : f32
    %88 = vector.broadcast %cst_21 : f32 to vector<2x128xf32>
    %89 = arith.addf %88, %87 : vector<2x128xf32>
    %90 = arith.divf %88, %89 : vector<2x128xf32>
    %91 = vector.extract_strided_slice %90 {offsets = [0, 0], sizes = [2, 32], strides = [1, 1]} : vector<2x128xf32> to vector<2x32xf32>
    %92 = vector.extract_strided_slice %90 {offsets = [0, 32], sizes = [2, 32], strides = [1, 1]} : vector<2x128xf32> to vector<2x32xf32>
    %93 = vector.extract_strided_slice %90 {offsets = [0, 64], sizes = [2, 32], strides = [1, 1]} : vector<2x128xf32> to vector<2x32xf32>
    %cst_22 = arith.constant 2.000000e+00 : f32
    %94 = vector.broadcast %cst_22 : f32 to vector<2x32xf32>
    %95 = arith.mulf %94, %93 : vector<2x32xf32>
    %cst_23 = arith.constant 1.000000e+00 : f32
    %96 = vector.broadcast %cst_23 : f32 to vector<2x32xf32>
    %97 = arith.subf %95, %96 : vector<2x32xf32>
    %98 = vector.extract_strided_slice %90 {offsets = [0, 96], sizes = [2, 32], strides = [1, 1]} : vector<2x128xf32> to vector<2x32xf32>
    %99 = arith.mulf %92, %57 : vector<2x32xf32>
    %100 = arith.mulf %91, %97 : vector<2x32xf32>
    %101 = arith.addf %99, %100 : vector<2x32xf32>
    %102 = math.tanh %101 : vector<2x32xf32>
    %103 = arith.mulf %98, %102 : vector<2x32xf32>
    %104 = vector.extract_strided_slice %14 {offsets = [0, 2, 0], sizes = [2, 1, 128], strides = [1, 1, 1]} : vector<2x8x128xf32> to vector<2x1x128xf32>
    %105 = vector.shape_cast %104 : vector<2x1x128xf32> to vector<2x128xf32>
    %106 = vector.extract_strided_slice %83 {offsets = [0, 0], sizes = [2, 128], strides = [1, 1]} : vector<2x256xf32> to vector<2x128xf32>
    %107 = arith.addf %105, %106 : vector<2x128xf32>
    %108 = arith.negf %107 : vector<2x128xf32>
    %109 = math.exp %108 : vector<2x128xf32>
    %cst_24 = arith.constant 1.000000e+00 : f32
    %110 = vector.broadcast %cst_24 : f32 to vector<2x128xf32>
    %111 = arith.addf %110, %109 : vector<2x128xf32>
    %112 = arith.divf %110, %111 : vector<2x128xf32>
    %113 = vector.extract_strided_slice %112 {offsets = [0, 0], sizes = [2, 32], strides = [1, 1]} : vector<2x128xf32> to vector<2x32xf32>
    %114 = vector.extract_strided_slice %112 {offsets = [0, 32], sizes = [2, 32], strides = [1, 1]} : vector<2x128xf32> to vector<2x32xf32>
    %115 = vector.extract_strided_slice %112 {offsets = [0, 64], sizes = [2, 32], strides = [1, 1]} : vector<2x128xf32> to vector<2x32xf32>
    %cst_25 = arith.constant 2.000000e+00 : f32
    %116 = vector.broadcast %cst_25 : f32 to vector<2x32xf32>
    %117 = arith.mulf %116, %115 : vector<2x32xf32>
    %cst_26 = arith.constant 1.000000e+00 : f32
    %118 = vector.broadcast %cst_26 : f32 to vector<2x32xf32>
    %119 = arith.subf %117, %118 : vector<2x32xf32>
    %120 = vector.extract_strided_slice %112 {offsets = [0, 96], sizes = [2, 32], strides = [1, 1]} : vector<2x128xf32> to vector<2x32xf32>
    %121 = arith.mulf %114, %79 : vector<2x32xf32>
    %122 = arith.mulf %113, %119 : vector<2x32xf32>
    %123 = arith.addf %121, %122 : vector<2x32xf32>
    %124 = math.tanh %123 : vector<2x32xf32>
    %125 = arith.mulf %120, %124 : vector<2x32xf32>
    %126 = tpu.concatenate %125, %103 in 1 : vector<2x32xf32>, vector<2x32xf32> -> vector<2x64xf32>
    %cst_27 = arith.constant dense<0.000000e+00> : vector<2x256xf32>
    %127 = tpu.matmul %126, %8, %cst_27 {dimension_numbers = #tpu.dot_dimension_numbers<[1], [0], [0], [1], [0, 0, 1, 1], [], []>} : vector<2x64xf32>, vector<64x256xf32>, vector<2x256xf32> -> vector<2x256xf32>
    %128 = vector.extract_strided_slice %127 {offsets = [0, 128], sizes = [2, 128], strides = [1, 1]} : vector<2x256xf32> to vector<2x128xf32>
    %129 = arith.addf %128, %16 : vector<2x128xf32>
    %130 = arith.negf %129 : vector<2x128xf32>
    %131 = math.exp %130 : vector<2x128xf32>
    %cst_28 = arith.constant 1.000000e+00 : f32
    %132 = vector.broadcast %cst_28 : f32 to vector<2x128xf32>
    %133 = arith.addf %132, %131 : vector<2x128xf32>
    %134 = arith.divf %132, %133 : vector<2x128xf32>
    %135 = vector.extract_strided_slice %134 {offsets = [0, 0], sizes = [2, 32], strides = [1, 1]} : vector<2x128xf32> to vector<2x32xf32>
    %136 = vector.extract_strided_slice %134 {offsets = [0, 32], sizes = [2, 32], strides = [1, 1]} : vector<2x128xf32> to vector<2x32xf32>
    %137 = vector.extract_strided_slice %134 {offsets = [0, 64], sizes = [2, 32], strides = [1, 1]} : vector<2x128xf32> to vector<2x32xf32>
    %cst_29 = arith.constant 2.000000e+00 : f32
    %138 = vector.broadcast %cst_29 : f32 to vector<2x32xf32>
    %139 = arith.mulf %138, %137 : vector<2x32xf32>
    %cst_30 = arith.constant 1.000000e+00 : f32
    %140 = vector.broadcast %cst_30 : f32 to vector<2x32xf32>
    %141 = arith.subf %139, %140 : vector<2x32xf32>
    %142 = vector.extract_strided_slice %134 {offsets = [0, 96], sizes = [2, 32], strides = [1, 1]} : vector<2x128xf32> to vector<2x32xf32>
    %143 = arith.mulf %136, %101 : vector<2x32xf32>
    %144 = arith.mulf %135, %141 : vector<2x32xf32>
    %145 = arith.addf %143, %144 : vector<2x32xf32>
    %146 = math.tanh %145 : vector<2x32xf32>
    %147 = arith.mulf %142, %146 : vector<2x32xf32>
    %148 = vector.extract_strided_slice %14 {offsets = [0, 3, 0], sizes = [2, 1, 128], strides = [1, 1, 1]} : vector<2x8x128xf32> to vector<2x1x128xf32>
    %149 = vector.shape_cast %148 : vector<2x1x128xf32> to vector<2x128xf32>
    %150 = vector.extract_strided_slice %127 {offsets = [0, 0], sizes = [2, 128], strides = [1, 1]} : vector<2x256xf32> to vector<2x128xf32>
    %151 = arith.addf %149, %150 : vector<2x128xf32>
    %152 = arith.negf %151 : vector<2x128xf32>
    %153 = math.exp %152 : vector<2x128xf32>
    %cst_31 = arith.constant 1.000000e+00 : f32
    %154 = vector.broadcast %cst_31 : f32 to vector<2x128xf32>
    %155 = arith.addf %154, %153 : vector<2x128xf32>
    %156 = arith.divf %154, %155 : vector<2x128xf32>
    %157 = vector.extract_strided_slice %156 {offsets = [0, 0], sizes = [2, 32], strides = [1, 1]} : vector<2x128xf32> to vector<2x32xf32>
    %158 = vector.extract_strided_slice %156 {offsets = [0, 32], sizes = [2, 32], strides = [1, 1]} : vector<2x128xf32> to vector<2x32xf32>
    %159 = vector.extract_strided_slice %156 {offsets = [0, 64], sizes = [2, 32], strides = [1, 1]} : vector<2x128xf32> to vector<2x32xf32>
    %cst_32 = arith.constant 2.000000e+00 : f32
    %160 = vector.broadcast %cst_32 : f32 to vector<2x32xf32>
    %161 = arith.mulf %160, %159 : vector<2x32xf32>
    %cst_33 = arith.constant 1.000000e+00 : f32
    %162 = vector.broadcast %cst_33 : f32 to vector<2x32xf32>
    %163 = arith.subf %161, %162 : vector<2x32xf32>
    %164 = vector.extract_strided_slice %156 {offsets = [0, 96], sizes = [2, 32], strides = [1, 1]} : vector<2x128xf32> to vector<2x32xf32>
    %165 = arith.mulf %158, %123 : vector<2x32xf32>
    %166 = arith.mulf %157, %163 : vector<2x32xf32>
    %167 = arith.addf %165, %166 : vector<2x32xf32>
    %168 = math.tanh %167 : vector<2x32xf32>
    %169 = arith.mulf %164, %168 : vector<2x32xf32>
    %170 = tpu.concatenate %169, %147 in 1 : vector<2x32xf32>, vector<2x32xf32> -> vector<2x64xf32>
    %cst_34 = arith.constant dense<0.000000e+00> : vector<2x256xf32>
    %171 = tpu.matmul %170, %8, %cst_34 {dimension_numbers = #tpu.dot_dimension_numbers<[1], [0], [0], [1], [0, 0, 1, 1], [], []>} : vector<2x64xf32>, vector<64x256xf32>, vector<2x256xf32> -> vector<2x256xf32>
    %172 = vector.extract_strided_slice %171 {offsets = [0, 128], sizes = [2, 128], strides = [1, 1]} : vector<2x256xf32> to vector<2x128xf32>
    %173 = arith.addf %172, %16 : vector<2x128xf32>
    %174 = arith.negf %173 : vector<2x128xf32>
    %175 = math.exp %174 : vector<2x128xf32>
    %cst_35 = arith.constant 1.000000e+00 : f32
    %176 = vector.broadcast %cst_35 : f32 to vector<2x128xf32>
    %177 = arith.addf %176, %175 : vector<2x128xf32>
    %178 = arith.divf %176, %177 : vector<2x128xf32>
    %179 = vector.extract_strided_slice %178 {offsets = [0, 0], sizes = [2, 32], strides = [1, 1]} : vector<2x128xf32> to vector<2x32xf32>
    %180 = vector.extract_strided_slice %178 {offsets = [0, 32], sizes = [2, 32], strides = [1, 1]} : vector<2x128xf32> to vector<2x32xf32>
    %181 = vector.extract_strided_slice %178 {offsets = [0, 64], sizes = [2, 32], strides = [1, 1]} : vector<2x128xf32> to vector<2x32xf32>
    %cst_36 = arith.constant 2.000000e+00 : f32
    %182 = vector.broadcast %cst_36 : f32 to vector<2x32xf32>
    %183 = arith.mulf %182, %181 : vector<2x32xf32>
    %cst_37 = arith.constant 1.000000e+00 : f32
    %184 = vector.broadcast %cst_37 : f32 to vector<2x32xf32>
    %185 = arith.subf %183, %184 : vector<2x32xf32>
    %186 = vector.extract_strided_slice %178 {offsets = [0, 96], sizes = [2, 32], strides = [1, 1]} : vector<2x128xf32> to vector<2x32xf32>
    %187 = arith.mulf %180, %145 : vector<2x32xf32>
    %188 = arith.mulf %179, %185 : vector<2x32xf32>
    %189 = arith.addf %187, %188 : vector<2x32xf32>
    %190 = math.tanh %189 : vector<2x32xf32>
    %191 = arith.mulf %186, %190 : vector<2x32xf32>
    %192 = vector.extract_strided_slice %14 {offsets = [0, 4, 0], sizes = [2, 1, 128], strides = [1, 1, 1]} : vector<2x8x128xf32> to vector<2x1x128xf32>
    %193 = vector.shape_cast %192 : vector<2x1x128xf32> to vector<2x128xf32>
    %194 = vector.extract_strided_slice %171 {offsets = [0, 0], sizes = [2, 128], strides = [1, 1]} : vector<2x256xf32> to vector<2x128xf32>
    %195 = arith.addf %193, %194 : vector<2x128xf32>
    %196 = arith.negf %195 : vector<2x128xf32>
    %197 = math.exp %196 : vector<2x128xf32>
    %cst_38 = arith.constant 1.000000e+00 : f32
    %198 = vector.broadcast %cst_38 : f32 to vector<2x128xf32>
    %199 = arith.addf %198, %197 : vector<2x128xf32>
    %200 = arith.divf %198, %199 : vector<2x128xf32>
    %201 = vector.extract_strided_slice %200 {offsets = [0, 0], sizes = [2, 32], strides = [1, 1]} : vector<2x128xf32> to vector<2x32xf32>
    %202 = vector.extract_strided_slice %200 {offsets = [0, 32], sizes = [2, 32], strides = [1, 1]} : vector<2x128xf32> to vector<2x32xf32>
    %203 = vector.extract_strided_slice %200 {offsets = [0, 64], sizes = [2, 32], strides = [1, 1]} : vector<2x128xf32> to vector<2x32xf32>
    %cst_39 = arith.constant 2.000000e+00 : f32
    %204 = vector.broadcast %cst_39 : f32 to vector<2x32xf32>
    %205 = arith.mulf %204, %203 : vector<2x32xf32>
    %cst_40 = arith.constant 1.000000e+00 : f32
    %206 = vector.broadcast %cst_40 : f32 to vector<2x32xf32>
    %207 = arith.subf %205, %206 : vector<2x32xf32>
    %208 = vector.extract_strided_slice %200 {offsets = [0, 96], sizes = [2, 32], strides = [1, 1]} : vector<2x128xf32> to vector<2x32xf32>
    %209 = arith.mulf %202, %167 : vector<2x32xf32>
    %210 = arith.mulf %201, %207 : vector<2x32xf32>
    %211 = arith.addf %209, %210 : vector<2x32xf32>
    %212 = math.tanh %211 : vector<2x32xf32>
    %213 = arith.mulf %208, %212 : vector<2x32xf32>
    %214 = tpu.concatenate %213, %191 in 1 : vector<2x32xf32>, vector<2x32xf32> -> vector<2x64xf32>
    %cst_41 = arith.constant dense<0.000000e+00> : vector<2x256xf32>
    %215 = tpu.matmul %214, %8, %cst_41 {dimension_numbers = #tpu.dot_dimension_numbers<[1], [0], [0], [1], [0, 0, 1, 1], [], []>} : vector<2x64xf32>, vector<64x256xf32>, vector<2x256xf32> -> vector<2x256xf32>
    %216 = vector.extract_strided_slice %215 {offsets = [0, 128], sizes = [2, 128], strides = [1, 1]} : vector<2x256xf32> to vector<2x128xf32>
    %217 = arith.addf %216, %16 : vector<2x128xf32>
    %218 = arith.negf %217 : vector<2x128xf32>
    %219 = math.exp %218 : vector<2x128xf32>
    %cst_42 = arith.constant 1.000000e+00 : f32
    %220 = vector.broadcast %cst_42 : f32 to vector<2x128xf32>
    %221 = arith.addf %220, %219 : vector<2x128xf32>
    %222 = arith.divf %220, %221 : vector<2x128xf32>
    %223 = vector.extract_strided_slice %222 {offsets = [0, 0], sizes = [2, 32], strides = [1, 1]} : vector<2x128xf32> to vector<2x32xf32>
    %224 = vector.extract_strided_slice %222 {offsets = [0, 32], sizes = [2, 32], strides = [1, 1]} : vector<2x128xf32> to vector<2x32xf32>
    %225 = vector.extract_strided_slice %222 {offsets = [0, 64], sizes = [2, 32], strides = [1, 1]} : vector<2x128xf32> to vector<2x32xf32>
    %cst_43 = arith.constant 2.000000e+00 : f32
    %226 = vector.broadcast %cst_43 : f32 to vector<2x32xf32>
    %227 = arith.mulf %226, %225 : vector<2x32xf32>
    %cst_44 = arith.constant 1.000000e+00 : f32
    %228 = vector.broadcast %cst_44 : f32 to vector<2x32xf32>
    %229 = arith.subf %227, %228 : vector<2x32xf32>
    %230 = vector.extract_strided_slice %222 {offsets = [0, 96], sizes = [2, 32], strides = [1, 1]} : vector<2x128xf32> to vector<2x32xf32>
    %231 = arith.mulf %224, %189 : vector<2x32xf32>
    %232 = arith.mulf %223, %229 : vector<2x32xf32>
    %233 = arith.addf %231, %232 : vector<2x32xf32>
    %234 = math.tanh %233 : vector<2x32xf32>
    %235 = arith.mulf %230, %234 : vector<2x32xf32>
    %236 = vector.extract_strided_slice %14 {offsets = [0, 5, 0], sizes = [2, 1, 128], strides = [1, 1, 1]} : vector<2x8x128xf32> to vector<2x1x128xf32>
    %237 = vector.shape_cast %236 : vector<2x1x128xf32> to vector<2x128xf32>
    %238 = vector.extract_strided_slice %215 {offsets = [0, 0], sizes = [2, 128], strides = [1, 1]} : vector<2x256xf32> to vector<2x128xf32>
    %239 = arith.addf %237, %238 : vector<2x128xf32>
    %240 = arith.negf %239 : vector<2x128xf32>
    %241 = math.exp %240 : vector<2x128xf32>
    %cst_45 = arith.constant 1.000000e+00 : f32
    %242 = vector.broadcast %cst_45 : f32 to vector<2x128xf32>
    %243 = arith.addf %242, %241 : vector<2x128xf32>
    %244 = arith.divf %242, %243 : vector<2x128xf32>
    %245 = vector.extract_strided_slice %244 {offsets = [0, 0], sizes = [2, 32], strides = [1, 1]} : vector<2x128xf32> to vector<2x32xf32>
    %246 = vector.extract_strided_slice %244 {offsets = [0, 32], sizes = [2, 32], strides = [1, 1]} : vector<2x128xf32> to vector<2x32xf32>
    %247 = vector.extract_strided_slice %244 {offsets = [0, 64], sizes = [2, 32], strides = [1, 1]} : vector<2x128xf32> to vector<2x32xf32>
    %cst_46 = arith.constant 2.000000e+00 : f32
    %248 = vector.broadcast %cst_46 : f32 to vector<2x32xf32>
    %249 = arith.mulf %248, %247 : vector<2x32xf32>
    %cst_47 = arith.constant 1.000000e+00 : f32
    %250 = vector.broadcast %cst_47 : f32 to vector<2x32xf32>
    %251 = arith.subf %249, %250 : vector<2x32xf32>
    %252 = vector.extract_strided_slice %244 {offsets = [0, 96], sizes = [2, 32], strides = [1, 1]} : vector<2x128xf32> to vector<2x32xf32>
    %253 = arith.mulf %246, %211 : vector<2x32xf32>
    %254 = arith.mulf %245, %251 : vector<2x32xf32>
    %255 = arith.addf %253, %254 : vector<2x32xf32>
    %256 = math.tanh %255 : vector<2x32xf32>
    %257 = arith.mulf %252, %256 : vector<2x32xf32>
    %258 = tpu.concatenate %257, %235 in 1 : vector<2x32xf32>, vector<2x32xf32> -> vector<2x64xf32>
    %cst_48 = arith.constant dense<0.000000e+00> : vector<2x256xf32>
    %259 = tpu.matmul %258, %8, %cst_48 {dimension_numbers = #tpu.dot_dimension_numbers<[1], [0], [0], [1], [0, 0, 1, 1], [], []>} : vector<2x64xf32>, vector<64x256xf32>, vector<2x256xf32> -> vector<2x256xf32>
    %260 = vector.extract_strided_slice %259 {offsets = [0, 128], sizes = [2, 128], strides = [1, 1]} : vector<2x256xf32> to vector<2x128xf32>
    %261 = arith.addf %260, %16 : vector<2x128xf32>
    %262 = arith.negf %261 : vector<2x128xf32>
    %263 = math.exp %262 : vector<2x128xf32>
    %cst_49 = arith.constant 1.000000e+00 : f32
    %264 = vector.broadcast %cst_49 : f32 to vector<2x128xf32>
    %265 = arith.addf %264, %263 : vector<2x128xf32>
    %266 = arith.divf %264, %265 : vector<2x128xf32>
    %267 = vector.extract_strided_slice %266 {offsets = [0, 0], sizes = [2, 32], strides = [1, 1]} : vector<2x128xf32> to vector<2x32xf32>
    %268 = vector.extract_strided_slice %266 {offsets = [0, 32], sizes = [2, 32], strides = [1, 1]} : vector<2x128xf32> to vector<2x32xf32>
    %269 = vector.extract_strided_slice %266 {offsets = [0, 64], sizes = [2, 32], strides = [1, 1]} : vector<2x128xf32> to vector<2x32xf32>
    %cst_50 = arith.constant 2.000000e+00 : f32
    %270 = vector.broadcast %cst_50 : f32 to vector<2x32xf32>
    %271 = arith.mulf %270, %269 : vector<2x32xf32>
    %cst_51 = arith.constant 1.000000e+00 : f32
    %272 = vector.broadcast %cst_51 : f32 to vector<2x32xf32>
    %273 = arith.subf %271, %272 : vector<2x32xf32>
    %274 = vector.extract_strided_slice %266 {offsets = [0, 96], sizes = [2, 32], strides = [1, 1]} : vector<2x128xf32> to vector<2x32xf32>
    %275 = arith.mulf %268, %233 : vector<2x32xf32>
    %276 = arith.mulf %267, %273 : vector<2x32xf32>
    %277 = arith.addf %275, %276 : vector<2x32xf32>
    %278 = math.tanh %277 : vector<2x32xf32>
    %279 = arith.mulf %274, %278 : vector<2x32xf32>
    %280 = vector.extract_strided_slice %14 {offsets = [0, 6, 0], sizes = [2, 1, 128], strides = [1, 1, 1]} : vector<2x8x128xf32> to vector<2x1x128xf32>
    %281 = vector.shape_cast %280 : vector<2x1x128xf32> to vector<2x128xf32>
    %282 = vector.extract_strided_slice %259 {offsets = [0, 0], sizes = [2, 128], strides = [1, 1]} : vector<2x256xf32> to vector<2x128xf32>
    %283 = arith.addf %281, %282 : vector<2x128xf32>
    %284 = arith.negf %283 : vector<2x128xf32>
    %285 = math.exp %284 : vector<2x128xf32>
    %cst_52 = arith.constant 1.000000e+00 : f32
    %286 = vector.broadcast %cst_52 : f32 to vector<2x128xf32>
    %287 = arith.addf %286, %285 : vector<2x128xf32>
    %288 = arith.divf %286, %287 : vector<2x128xf32>
    %289 = vector.extract_strided_slice %288 {offsets = [0, 0], sizes = [2, 32], strides = [1, 1]} : vector<2x128xf32> to vector<2x32xf32>
    %290 = vector.extract_strided_slice %288 {offsets = [0, 32], sizes = [2, 32], strides = [1, 1]} : vector<2x128xf32> to vector<2x32xf32>
    %291 = vector.extract_strided_slice %288 {offsets = [0, 64], sizes = [2, 32], strides = [1, 1]} : vector<2x128xf32> to vector<2x32xf32>
    %cst_53 = arith.constant 2.000000e+00 : f32
    %292 = vector.broadcast %cst_53 : f32 to vector<2x32xf32>
    %293 = arith.mulf %292, %291 : vector<2x32xf32>
    %cst_54 = arith.constant 1.000000e+00 : f32
    %294 = vector.broadcast %cst_54 : f32 to vector<2x32xf32>
    %295 = arith.subf %293, %294 : vector<2x32xf32>
    %296 = vector.extract_strided_slice %288 {offsets = [0, 96], sizes = [2, 32], strides = [1, 1]} : vector<2x128xf32> to vector<2x32xf32>
    %297 = arith.mulf %290, %255 : vector<2x32xf32>
    %298 = arith.mulf %289, %295 : vector<2x32xf32>
    %299 = arith.addf %297, %298 : vector<2x32xf32>
    %300 = math.tanh %299 : vector<2x32xf32>
    %301 = arith.mulf %296, %300 : vector<2x32xf32>
    %302 = tpu.concatenate %301, %279 in 1 : vector<2x32xf32>, vector<2x32xf32> -> vector<2x64xf32>
    %cst_55 = arith.constant dense<0.000000e+00> : vector<2x256xf32>
    %303 = tpu.matmul %302, %8, %cst_55 {dimension_numbers = #tpu.dot_dimension_numbers<[1], [0], [0], [1], [0, 0, 1, 1], [], []>} : vector<2x64xf32>, vector<64x256xf32>, vector<2x256xf32> -> vector<2x256xf32>
    %304 = vector.extract_strided_slice %303 {offsets = [0, 128], sizes = [2, 128], strides = [1, 1]} : vector<2x256xf32> to vector<2x128xf32>
    %305 = arith.addf %304, %16 : vector<2x128xf32>
    %306 = arith.negf %305 : vector<2x128xf32>
    %307 = math.exp %306 : vector<2x128xf32>
    %cst_56 = arith.constant 1.000000e+00 : f32
    %308 = vector.broadcast %cst_56 : f32 to vector<2x128xf32>
    %309 = arith.addf %308, %307 : vector<2x128xf32>
    %310 = arith.divf %308, %309 : vector<2x128xf32>
    %311 = vector.extract_strided_slice %310 {offsets = [0, 0], sizes = [2, 32], strides = [1, 1]} : vector<2x128xf32> to vector<2x32xf32>
    %312 = vector.extract_strided_slice %310 {offsets = [0, 32], sizes = [2, 32], strides = [1, 1]} : vector<2x128xf32> to vector<2x32xf32>
    %313 = vector.extract_strided_slice %310 {offsets = [0, 64], sizes = [2, 32], strides = [1, 1]} : vector<2x128xf32> to vector<2x32xf32>
    %cst_57 = arith.constant 2.000000e+00 : f32
    %314 = vector.broadcast %cst_57 : f32 to vector<2x32xf32>
    %315 = arith.mulf %314, %313 : vector<2x32xf32>
    %cst_58 = arith.constant 1.000000e+00 : f32
    %316 = vector.broadcast %cst_58 : f32 to vector<2x32xf32>
    %317 = arith.subf %315, %316 : vector<2x32xf32>
    %318 = vector.extract_strided_slice %310 {offsets = [0, 96], sizes = [2, 32], strides = [1, 1]} : vector<2x128xf32> to vector<2x32xf32>
    %319 = arith.mulf %312, %277 : vector<2x32xf32>
    %320 = arith.mulf %311, %317 : vector<2x32xf32>
    %321 = arith.addf %319, %320 : vector<2x32xf32>
    %322 = math.tanh %321 : vector<2x32xf32>
    %323 = arith.mulf %318, %322 : vector<2x32xf32>
    %324 = vector.extract_strided_slice %14 {offsets = [0, 7, 0], sizes = [2, 1, 128], strides = [1, 1, 1]} : vector<2x8x128xf32> to vector<2x1x128xf32>
    %325 = vector.shape_cast %324 : vector<2x1x128xf32> to vector<2x128xf32>
    %326 = vector.extract_strided_slice %303 {offsets = [0, 0], sizes = [2, 128], strides = [1, 1]} : vector<2x256xf32> to vector<2x128xf32>
    %327 = arith.addf %325, %326 : vector<2x128xf32>
    %328 = arith.negf %327 : vector<2x128xf32>
    %329 = math.exp %328 : vector<2x128xf32>
    %cst_59 = arith.constant 1.000000e+00 : f32
    %330 = vector.broadcast %cst_59 : f32 to vector<2x128xf32>
    %331 = arith.addf %330, %329 : vector<2x128xf32>
    %332 = arith.divf %330, %331 : vector<2x128xf32>
    %333 = vector.extract_strided_slice %332 {offsets = [0, 0], sizes = [2, 32], strides = [1, 1]} : vector<2x128xf32> to vector<2x32xf32>
    %334 = vector.extract_strided_slice %332 {offsets = [0, 32], sizes = [2, 32], strides = [1, 1]} : vector<2x128xf32> to vector<2x32xf32>
    %335 = vector.extract_strided_slice %332 {offsets = [0, 64], sizes = [2, 32], strides = [1, 1]} : vector<2x128xf32> to vector<2x32xf32>
    %cst_60 = arith.constant 2.000000e+00 : f32
    %336 = vector.broadcast %cst_60 : f32 to vector<2x32xf32>
    %337 = arith.mulf %336, %335 : vector<2x32xf32>
    %cst_61 = arith.constant 1.000000e+00 : f32
    %338 = vector.broadcast %cst_61 : f32 to vector<2x32xf32>
    %339 = arith.subf %337, %338 : vector<2x32xf32>
    %340 = vector.extract_strided_slice %332 {offsets = [0, 96], sizes = [2, 32], strides = [1, 1]} : vector<2x128xf32> to vector<2x32xf32>
    %341 = arith.mulf %334, %299 : vector<2x32xf32>
    %342 = arith.mulf %333, %339 : vector<2x32xf32>
    %343 = arith.addf %341, %342 : vector<2x32xf32>
    %344 = math.tanh %343 : vector<2x32xf32>
    %345 = arith.mulf %340, %344 : vector<2x32xf32>
    %346 = tpu.concatenate %345, %323 in 1 : vector<2x32xf32>, vector<2x32xf32> -> vector<2x64xf32>
    %cst_62 = arith.constant dense<0.000000e+00> : vector<2x256xf32>
    %347 = tpu.matmul %346, %8, %cst_62 {dimension_numbers = #tpu.dot_dimension_numbers<[1], [0], [0], [1], [0, 0, 1, 1], [], []>} : vector<2x64xf32>, vector<64x256xf32>, vector<2x256xf32> -> vector<2x256xf32>
    %348 = vector.extract_strided_slice %347 {offsets = [0, 128], sizes = [2, 128], strides = [1, 1]} : vector<2x256xf32> to vector<2x128xf32>
    %349 = arith.addf %348, %16 : vector<2x128xf32>
    %350 = arith.negf %349 : vector<2x128xf32>
    %351 = math.exp %350 : vector<2x128xf32>
    %cst_63 = arith.constant 1.000000e+00 : f32
    %352 = vector.broadcast %cst_63 : f32 to vector<2x128xf32>
    %353 = arith.addf %352, %351 : vector<2x128xf32>
    %354 = arith.divf %352, %353 : vector<2x128xf32>
    %355 = vector.extract_strided_slice %354 {offsets = [0, 0], sizes = [2, 32], strides = [1, 1]} : vector<2x128xf32> to vector<2x32xf32>
    %356 = vector.extract_strided_slice %354 {offsets = [0, 32], sizes = [2, 32], strides = [1, 1]} : vector<2x128xf32> to vector<2x32xf32>
    %357 = vector.extract_strided_slice %354 {offsets = [0, 64], sizes = [2, 32], strides = [1, 1]} : vector<2x128xf32> to vector<2x32xf32>
    %cst_64 = arith.constant 2.000000e+00 : f32
    %358 = vector.broadcast %cst_64 : f32 to vector<2x32xf32>
    %359 = arith.mulf %358, %357 : vector<2x32xf32>
    %cst_65 = arith.constant 1.000000e+00 : f32
    %360 = vector.broadcast %cst_65 : f32 to vector<2x32xf32>
    %361 = arith.subf %359, %360 : vector<2x32xf32>
    %362 = vector.extract_strided_slice %354 {offsets = [0, 96], sizes = [2, 32], strides = [1, 1]} : vector<2x128xf32> to vector<2x32xf32>
    %363 = arith.mulf %356, %321 : vector<2x32xf32>
    %364 = arith.mulf %355, %361 : vector<2x32xf32>
    %365 = arith.addf %363, %364 : vector<2x32xf32>
    %366 = math.tanh %365 : vector<2x32xf32>
    %367 = arith.mulf %362, %366 : vector<2x32xf32>
    %cst_66 = arith.constant dense<0.000000e+00> : vector<2x128xf32>
    %368 = tpu.matmul %367, %6, %cst_66 {dimension_numbers = #tpu.dot_dimension_numbers<[1], [0], [0], [1], [0, 0, 1, 1], [], []>} : vector<2x32xf32>, vector<32x128xf32>, vector<2x128xf32> -> vector<2x128xf32>
    %369 = vector.broadcast %4 : vector<1x128xf32> to vector<2x128xf32>
    %370 = arith.addf %368, %369 : vector<2x128xf32>
    %cst_67 = arith.constant 0.000000e+00 : f32
    %371 = vector.broadcast %cst_67 : f32 to vector<2x128xf32>
    %372 = arith.maximumf %370, %371 : vector<2x128xf32>
    %cst_68 = arith.constant dense<0.000000e+00> : vector<2x128xf32>
    %373 = tpu.matmul %372, %7, %cst_68 {dimension_numbers = #tpu.dot_dimension_numbers<[1], [0], [0], [1], [0, 0, 1, 1], [], []>} : vector<2x128xf32>, vector<128x128xf32>, vector<2x128xf32> -> vector<2x128xf32>
    %374 = vector.broadcast %5 : vector<1x128xf32> to vector<2x128xf32>
    %375 = arith.addf %373, %374 : vector<2x128xf32>
    %376 = tpu.iota {dimensions = array<i32: 1>} : vector<2x128xi32>
    %c4_i32 = arith.constant 4 : i32
    %377 = vector.broadcast %c4_i32 : i32 to vector<2x128xi32>
    %378 = arith.cmpi slt, %376, %377 : vector<2x128xi32>
    %379 = arith.negf %375 : vector<2x128xf32>
    %380 = math.exp %379 : vector<2x128xf32>
    %cst_69 = arith.constant 1.000000e+00 : f32
    %381 = vector.broadcast %cst_69 : f32 to vector<2x128xf32>
    %382 = arith.addf %381, %380 : vector<2x128xf32>
    %383 = arith.divf %381, %382 : vector<2x128xf32>
    %384 = arith.select %378, %383, %375 : vector<2x128xi1>, vector<2x128xf32>
    %c0_70 = arith.constant 0 : index
    %c0_71 = arith.constant 0 : index
    %385 = vector.load %arg3[%c0_70, %c0_71] : memref<2x128xf32, #tpu.memory_space<vmem>>, vector<2x128xf32>
    tpu.vector_store %arg3[%c0_70, %c0_71], %384 {strides = array<i32>} : memref<2x128xf32, #tpu.memory_space<vmem>>, vector<2x128xf32>,
    return
  }
}

</mosaic_0001>

<bundles_post_ra>
// kernel: lstm_actor_critic_forward.1
= control target key start
LH: loop header
LB: loop body
LE: loop exit
PB: predicated region body
PF: predicated region fallthrough
CT: control target
= control target key end

     0   :  { %8 = vsyncpa [#allocation3], 0  ;;  %s2605_s0 = inlined_call_operand.hbm [shape: f32[2,8,16], index: 0, kind: input, shape index: {}]   ;;  %s2606_s1 = inlined_call_operand.hbm [shape: f32[184,128], index: 1, kind: input, shape index: {}]   ;;  %s2607_s2 = inlined_call_operand.hbm [shape: f32[64,256], index: 2, kind: input, shape index: {}]   ;;  %s2608_s3 = inlined_call_operand.vmem [shape: f32[2,128], index: 3, kind: output, shape index: {}]  }
   0x1   :  { %9 = vsyncpa [#allocation5], 0  ;;  %s2146_s12 = smov [#allocation4]   ;;  %s2147_s14 = smov [#allocation2]  }
   0x2   :  { %s27_s13 = sshll.u32 %s2146_s12, 4  ;;  %s15_s15 = sshll.u32 %s2147_s14, 4  ;;  %s28_s13 = int_to_ptr.vmem [resolvable:$true] %s27_s13  ;;  %s16_s15 = int_to_ptr.vmem [resolvable:$true] %s15_s15 }
   0x3   :  { %s2090_s16 = scalar_lea.vmem %s28_s13, 2944  ;;  %p2095_p1 = scmp.lt.s32.totalorder %s28_s13, %s28_s13 }
   0x4   :  { %p2091_p0 = scmp.ne.s32.totalorder %s28_s13, %s2090_s16  ;;  %p2096_p2 = scmp.lt.s32.totalorder %s2090_s16, %s2090_s16 }
   0x6   :  { %p2097_p3 = por %p2096_p2, %p2095_p1 }
   0x8   :  { %p2098_p4 = pnand %p2097_p3, %p2091_p0 }
   0xa   :  { %2101 = shalt.err (!%p2098_p4)
}
   0xb   :  { %s2148_s17 = smov 128   ;;  %s2149_s18 = smov 8  }
   0xc   :  { %33 = dma.hbm_to_vmem [thread:$0]  %s2606_s1, 2944, %s28_s13, [#allocation5], %s2148_s17, %s2148_s17, %s2149_s18  }
   0xd   :  { %s2110_s21 = scalar_lea.vmem %s16_s15, 256  ;;  %p2115_p6 = scmp.lt.s32.totalorder %s16_s15, %s16_s15 }
   0xe   :  { %p2111_p5 = scmp.ne.s32.totalorder %s16_s15, %s2110_s21  ;;  %p2116_p7 = scmp.lt.s32.totalorder %s2110_s21, %s2110_s21 }
  0x10   :  { %p2117_p8 = por %p2116_p7, %p2115_p6 }
  0x12   :  { %p2118_p9 = pnand %p2117_p8, %p2111_p5 }
  0x14   :  { %2121 = shalt.err (!%p2118_p9)
}
  0x15   :  { %21 = dma.hbm_to_vmem [thread:$0]  %s2605_s0, 256, %s16_s15, [#allocation3], %s2148_s17, %s2148_s17, %s2149_s18  }
  0x16   :  { %s2150_s24 = smov [#allocation6]  }
  0x17   :  { %s39_s25 = sshll.u32 %s2150_s24, 4  ;;  %s40_s25 = int_to_ptr.vmem [resolvable:$true] %s39_s25 }
  0x18   :  { %s2130_s26 = scalar_lea.vmem %s40_s25, 2048  ;;  %p2135_p11 = scmp.lt.s32.totalorder %s40_s25, %s40_s25 }
  0x19   :  { %p2131_p10 = scmp.ne.s32.totalorder %s40_s25, %s2130_s26  ;;  %p2136_p12 = scmp.lt.s32.totalorder %s2130_s26, %s2130_s26 }
  0x1b   :  { %p2137_p13 = por %p2136_p12, %p2135_p11 }
  0x1d   :  { %p2138_p0 = pnand %p2137_p13, %p2131_p10 }
  0x1f   :  { %2141 = shalt.err (!%p2138_p0)
}
  0x20   :  { %s2151_s1 = smov 256   ;;  %s2152_s27 = smov 16  }
  0x21   :  { %45 = dma.hbm_to_vmem [thread:$0]  %s2607_s2, 2048, %s40_s25, [#allocation5], %s2151_s1, %s2151_s1, %s2152_s27  }
  0x22   :  { %2142 = dma.done.wait [#allocation3], 256  }
  0x23   :  { %2143 = vsyncadd [#allocation3], 4294967040 }
  0x24   :  { %2144 = dma.done.wait [#allocation5], 4992  }
  0x25   :  { %2145 = vsyncadd [#allocation5], 4294962304  ;;  %vm100_vm0 = vcmask 130048   ;;  %v56_v0 = vld [vmem:[#allocation4 + $0x8] sm:$0xff]  ;;  %v55_v1 = vld [vmem:[#allocation4] sm:$0xff]  ;;  %v96_v4 = vlaneseq  ;;  %s2153_s0 = smov 64  }
  0x26   :  { %v94_v2 = vld [vmem:[#allocation2] sm:$0xff]  ;;  %1854 = vmatprep.subr.mxu0 %v56_v0  ;;  %v95_v3 = vld [vmem:[#allocation2 + $0x8] sm:$0xff]  ;;  %s2154_s2 = smov 32   ;;  %v2221_v36 = vld [vmem:[#allocation6 + $0x70] sm:$0xff]  ;;  %v2155_v53 = vmov 0.0   ;;  %vm239_vm1 = vcmask 1041409  }
  0x27   :  { %1858 = vmatprep.mubr.msk.f32.mxu0 %vm100_vm0, %v94_v2  ;;  %1855 = vmatpush3.msra.mxu0 %v56_v0  ;;  %v2187_v5 = vshrl.u32 %v96_v4, 7  ;;  %v2190_v7 = vld [vmem:[#allocation4 + $0x10] sm:$0xff]  ;;  %v2223_v37 = vld [vmem:[#allocation6 + $0x68] sm:$0xff]  ;;  %v2226_v38 = vld [vmem:[#allocation6 + $0x60] sm:$0xff]  ;;  %vm244_vm2 = vcmask 261120   ;;  %vm246_vm3 = vcmask 523264  }
  0x28   :  { %1856 = vmatprep.subr.mxu0 %v55_v1  ;;  %v2219_v35 = vld [vmem:[#allocation6 + $0x78] sm:$0xff]  ;;  %v2234_v40 = vld [vmem:[#allocation6 + $0x50] sm:$0xff]  ;;  %v2238_v41 = vld [vmem:[#allocation6 + $0x48] sm:$0xff]  ;;  %314 = vmatprep.mubr.f32.mxu1 %v2155_v53  ;;  %vm412_vm4 = vcmask 1042434   ;;  %vm590_vm5 = vcmask 1043459   ;;  %vm768_vm6 = vcmask 1044484  }
  0x29   :  { %1857 = vmatpush3.msra.mxu0 %v55_v1  ;;  %v98_v6 = vsub.s32 0, %v2187_v5  ;;  %266 = vmatprep.subr.mxu1 %v2219_v35  ;;  %v2230_v39 = vld [vmem:[#allocation6 + $0x58] sm:$0xff]  ;;  %v2242_v43 = vld [vmem:[#allocation6 + $0x40] sm:$0xff]  ;;  %v2250_v45 = vld [vmem:[#allocation6 + $0x30] sm:$0xff]  ;;  %v184_v62 = vsub.s32 1, %v2187_v5  ;;  %vm946_vm7 = vcmask 1045509  }
  0x2a   :  { %1859 = vmatmul.mubr.msk.f32.vlgmr.msra.gmra.mxu0 %vm100_vm0, %v95_v3  ;;  %799 = vmatprep.subr.mxu0 %v2219_v35  ;;  %v2247_v44 = vld [vmem:[#allocation6 + $0x38] sm:$0xff]  ;;  %v2254_v46 = vld [vmem:[#allocation6 + $0x28] sm:$0xff]  ;;  %v2258_v48 = vld [vmem:[#allocation6 + $0x20] sm:$0xff]  ;;  %vm1124_vm8 = vcmask 1046534   ;;  %vm1302_vm9 = vcmask 1047559   ;;  %vm1495_vm10 = vcmask 1040384  }
  0x2b   :  { %v99_v8 = vrot.slane %v2190_v7, %v98_v6  ;;  %267 = vmatpush1.msra.mxu1 %v2221_v36  ;;  %800 = vmatpush1.msra.mxu0 %v2221_v36  ;;  %v2263_v49 = vld [vmem:[#allocation6 + $0x18] sm:$0xff]  ;;  %v2266_v50 = vld [vmem:[#allocation6 + $0x10] sm:$0xff]  ;;  %v2270_v51 = vld [vmem:[#allocation6 + $0x8] sm:$0xff]  ;;  %v2313_v63 = vrot.slane %v2190_v7, %v184_v62  ;;  %vm2156_vm11 = vmmov 0  }
  0x2c   :  { %268 = vmatprep.subr.mxu1 %v2223_v37  ;;  %801 = vmatprep.subr.mxu0 %v2223_v37  ;;  %v2281_v52 = vld [vmem:[#allocation6] sm:$0xff] }
  0x2d   :  { %269 = vmatpush1.msra.mxu1 %v2226_v38  ;;  %802 = vmatpush1.msra.mxu0 %v2226_v38 }
  0x2e   :  { %270 = vmatprep.subr.mxu1 %v2230_v39  ;;  %803 = vmatprep.subr.mxu0 %v2230_v39 }
  0x2f   :  { %271 = vmatpush1.msra.mxu1 %v2234_v40  ;;  %804 = vmatpush1.msra.mxu0 %v2234_v40 }
  0x30   :  { %272 = vmatprep.subr.mxu1 %v2238_v41  ;;  %805 = vmatprep.subr.mxu0 %v2238_v41 }
  0x31   :  { %273 = vmatpush1.msra.mxu1 %v2242_v43  ;;  %806 = vmatpush1.msra.mxu0 %v2242_v43 }
  0x32   :  { %274 = vmatprep.subr.mxu1 %v2247_v44  ;;  %807 = vmatprep.subr.mxu0 %v2247_v44 }
  0x33   :  { %275 = vmatpush1.msra.mxu1 %v2250_v45  ;;  %808 = vmatpush1.msra.mxu0 %v2250_v45 }
  0x34   :  { %276 = vmatprep.subr.mxu1 %v2254_v46  ;;  %809 = vmatprep.subr.mxu0 %v2254_v46 }
  0x35   :  { %277 = vmatpush1.msra.mxu1 %v2258_v48  ;;  %810 = vmatpush1.msra.mxu0 %v2258_v48 }
  0x36   :  { %278 = vmatprep.subr.mxu1 %v2263_v49  ;;  %811 = vmatprep.subr.mxu0 %v2263_v49 }
  0x37   :  { %279 = vmatpush1.msra.mxu1 %v2266_v50  ;;  %812 = vmatpush1.msra.mxu0 %v2266_v50 }
  0x38   :  { %280 = vmatprep.subr.mxu1 %v2270_v51  ;;  %813 = vmatprep.subr.mxu0 %v2270_v51 }
  0x39   :  { %281 = vmatpush1.msra.mxu1 %v2281_v52  ;;  %814 = vmatpush1.msra.mxu0 %v2281_v52 }
  0x3a   :  { %443 = vmatprep.subr.mxu1 %v2219_v35  ;;  %847 = vmatprep.mubr.f32.mxu0 %v2155_v53 }
  0x3b   :  { %1155 = vmatprep.subr.mxu0 %v2219_v35 }
  0xea   :  { %v1860_v9 = vpop.f32.mrf.mxu0 }
  0xeb   :  { %v2193_v10 = vadd.f32 %v1860_v9, %v99_v8 }
  0xec   :  { %v173_v11 = vpop.f32.mrf.mxu0 }
  0xed   :  { %v1771_v12 = vmul.f32 -1.442695, %v2193_v10  ;;  %v2196_v13 = vadd.f32 %v173_v11, %v99_v8 }
  0xef   :  { %1918 = vpow2.f32 %v1771_v12  ;;  %v1770_v14 = vmul.f32 -1.442695, %v2196_v13 }
  0xf1   :  { %1920 = vpow2.f32 %v1770_v14 }
  0xfc   :  { %v1919_v15 = vpop.eup %1918 }
  0xfd   :  { %v193_v16 = vadd.f32 1.0, %v1919_v15 }
  0xfe   :  { %v1921_v17 = vpop.eup %1920 }
  0xff   :  { %1922 = vrcp.f32 %v193_v16  ;;  %v192_v18 = vadd.f32 1.0, %v1921_v17 }
 0x101   :  { %1924 = vrcp.f32 %v192_v18 }
 0x10c   :  { %v2199_v19 = vpop.eup %1922 }
 0x10d   :  { %v199_v20 = vmul.f32 2.0, %v2199_v19  ;;  %v203_v29 = vmul.f32 0.0, %v2199_v19 }
 0x10e   :  { %v2202_v21 = vpop.eup %1924 }
 0x10f   :  { %v1773_v22 = vadd.f32 -1.0, %v199_v20  ;;  %v198_v23 = vmul.f32 2.0, %v2202_v21  ;;  %v202_v32 = vmul.f32 0.0, %v2202_v21 }
 0x111   :  { %208 = vrot.lane.b32.xlu0 %v1773_v22, %s2153_s0  ;;  %v1772_v24 = vadd.f32 -1.0, %v198_v23 }
 0x115   :  { %206 = vrot.lane.b32.xlu0 %v1772_v24, %s2153_s0 }
 0x183   :  { %v209_v25 = vpop.permute.xlu0 %208 }
 0x184   :  { %v213_v26 = vmul.f32 %v2199_v19, %v209_v25 }
 0x186   :  { %218 = vrot.lane.b32.xlu1 %v213_v26, %s2154_s2 }
 0x187   :  { %v207_v27 = vpop.permute.xlu0 %206 }
 0x188   :  { %v212_v28 = vmul.f32 %v2202_v21, %v207_v27 }
 0x18a   :  { %216 = vrot.lane.b32.xlu1 %v212_v28, %s2154_s2 }
 0x1f8   :  { %v219_v30 = vpop.permute.xlu1 %218 }
 0x1f9   :  { %v2212_v31 = vadd.f32 %v219_v30, %v203_v29 }
 0x1fb   :  { %1926 = vtanh.f32 %v2212_v31 }
 0x1fc   :  { %v217_v33 = vpop.permute.xlu1 %216 }
 0x1fd   :  { %v2216_v34 = vadd.f32 %v217_v33, %v202_v32 }
 0x1ff   :  { %1928 = vtanh.f32 %v2216_v34 }
 0x208   :  { %v1927_v42 = vpop.eup %1926 }
 0x209   :  { %230 = vrot.lane.b32.xlu0 %v1927_v42, %s2153_s0 }
 0x20c   :  { %v1929_v47 = vpop.eup %1928 }
 0x20d   :  { %228 = vrot.lane.b32.xlu1 %v1929_v47, %s2153_s0  ;;  %v372_v47 = vrot.slane %v2212_v31, 7 }
 0x27b   :  { %v231_v54 = vpop.permute.xlu0 %230 }
 0x27c   :  { %v235_v55 = vmul.f32 %v2199_v19, %v231_v54 }
 0x27e   :  { %v238_v57 = vrot.slane %v235_v55, 7 }
 0x27f   :  { %v229_v56 = vpop.permute.xlu1 %228 }
 0x280   :  { %v234_v58 = vmul.f32 %v2202_v21, %v229_v56  ;;  %v371_v56 = vrot.slane %v2216_v34, 7 }
 0x282   :  { %v240_v59 = vsel %vm239_vm1, %v238_v57, %v234_v58 }
 0x283   :  { %241 = vrot.lane.b32.xlu0 %v240_v59, %s2154_s2 }
 0x2f5   :  { %v242_v60 = vpop.permute.xlu0 %241 }
 0x2f6   :  { %v245_v61 = vsel %vm244_vm2, %v242_v60, 0.0 }
 0x2f7   :  { %1774 = vmatmul.mubr.msk.f32.vlgmr.msra.gmra.mxu1 %vm246_vm3, %v245_v61 }
 0x2f8   :  { %444 = vmatpush1.msra.mxu1 %v2221_v36  ;;  %491 = vmatprep.mubr.f32.mxu1 %v2155_v53 }
 0x2f9   :  { %445 = vmatprep.subr.mxu1 %v2223_v37 }
 0x2fa   :  { %446 = vmatpush1.msra.mxu1 %v2226_v38 }
 0x2fb   :  { %447 = vmatprep.subr.mxu1 %v2230_v39 }
 0x2fc   :  { %448 = vmatpush1.msra.mxu1 %v2234_v40 }
 0x2fd   :  { %449 = vmatprep.subr.mxu1 %v2238_v41 }
 0x2fe   :  { %450 = vmatpush1.msra.mxu1 %v2242_v43 }
 0x2ff   :  { %451 = vmatprep.subr.mxu1 %v2247_v44 }
 0x300   :  { %452 = vmatpush1.msra.mxu1 %v2250_v45 }
 0x301   :  { %453 = vmatprep.subr.mxu1 %v2254_v46 }
 0x302   :  { %454 = vmatpush1.msra.mxu1 %v2258_v48 }
 0x303   :  { %455 = vmatprep.subr.mxu1 %v2263_v49 }
 0x304   :  { %456 = vmatpush1.msra.mxu1 %v2266_v50 }
 0x305   :  { %457 = vmatprep.subr.mxu1 %v2270_v51 }
 0x306   :  { %458 = vmatpush1.msra.mxu1 %v2281_v52 }
 0x307   :  { %621 = vmatprep.subr.mxu1 %v2219_v35 }
 0x3b7   :  { %v316_v0 = vpop.f32.mrf.mxu1 }
 0x3b8   :  { %v348_v1 = vrot.slane %v316_v0, 7  ;;  %v352_v2 = vadd.f32 %v316_v0, %v2193_v10 }
 0x3b9   :  { %v318_v3 = vpop.f32.mrf.mxu1 }
 0x3ba   :  { %v351_v6 = vadd.f32 %v348_v1, %v2196_v13  ;;  %v1778_v8 = vmul.f32 -1.442695, %v352_v2  ;;  %v321_v9 = vadd.f32 %v318_v3, %v2313_v63 }
 0x3bc   :  { %v1777_v11 = vmul.f32 -1.442695, %v351_v6  ;;  %1930 = vpow2.f32 %v1778_v8  ;;  %v1775_v12 = vmul.f32 -1.442695, %v321_v9 }
 0x3be   :  { %1932 = vpow2.f32 %v1777_v11 }
 0x3bf   :  { %1934 = vpow2.f32 %v1775_v12 }
 0x3c9   :  { %v1931_v14 = vpop.eup %1930 }
 0x3ca   :  { %v360_v15 = vadd.f32 1.0, %v1931_v14 }
 0x3cb   :  { %v1933_v16 = vpop.eup %1932 }
 0x3cc   :  { %v1935_v7 = vpop.eup %1934  ;;  %v359_v17 = vadd.f32 1.0, %v1933_v16  ;;  %1936 = vrcp.f32 %v360_v15 }
 0x3cd   :  { %v325_v18 = vadd.f32 1.0, %v1935_v7 }
 0x3ce   :  { %1938 = vrcp.f32 %v359_v17 }
 0x3cf   :  { %1940 = vrcp.f32 %v325_v18 }
 0x3d9   :  { %v1937_v19 = vpop.eup %1936 }
 0x3da   :  { %v366_v20 = vmul.f32 2.0, %v1937_v19  ;;  %v376_v54 = vmul.f32 %v1937_v19, %v372_v47 }
 0x3db   :  { %v1939_v21 = vpop.eup %1938 }
 0x3dc   :  { %v1941_v22 = vpop.eup %1940  ;;  %v1780_v23 = vadd.f32 -1.0, %v366_v20  ;;  %v365_v24 = vmul.f32 2.0, %v1939_v21  ;;  %v375_v60 = vmul.f32 %v1939_v21, %v371_v56 }
 0x3dd   :  { %v328_v25 = vmul.f32 2.0, %v1941_v22  ;;  %v330_v58 = vmul.f32 0.0, %v1941_v22 }
 0x3de   :  { %381 = vrot.lane.b32.xlu1 %v1780_v23, %s2153_s0  ;;  %v1779_v27 = vadd.f32 -1.0, %v365_v24 }
 0x3df   :  { %v1776_v26 = vadd.f32 -1.0, %v328_v25 }
 0x3e1   :  { %332 = vrot.lane.b32.xlu0 %v1776_v26, %s2153_s0 }
 0x3e2   :  { %379 = vrot.lane.b32.xlu1 %v1779_v27, %s2153_s0 }
 0x450   :  { %v382_v28 = vpop.permute.xlu1 %381 }
 0x451   :  { %v386_v29 = vmul.f32 %v1937_v19, %v382_v28 }
 0x453   :  { %v333_v30 = vpop.permute.xlu0 %332  ;;  %391 = vrot.lane.b32.xlu0 %v386_v29, %s2154_s2 }
 0x454   :  { %v335_v32 = vmul.f32 %v1941_v22, %v333_v30  ;;  %v380_v33 = vpop.permute.xlu1 %379 }
 0x455   :  { %v385_v42 = vmul.f32 %v1939_v21, %v380_v33 }
 0x456   :  { %337 = vrot.lane.b32.xlu1 %v335_v32, %s2154_s2 }
 0x457   :  { %389 = vrot.lane.b32.xlu0 %v385_v42, %s2154_s2 }
 0x4c5   :  { %v392_v55 = vpop.permute.xlu0 %391 }
 0x4c6   :  { %v2326_v57 = vadd.f32 %v392_v55, %v376_v54 }
 0x4c8   :  { %1942 = vtanh.f32 %v2326_v57  ;;  %v338_v59 = vpop.permute.xlu1 %337 }
 0x4c9   :  { %v2329_v61 = vadd.f32 %v338_v59, %v330_v58  ;;  %v390_v62 = vpop.permute.xlu0 %389 }
 0x4ca   :  { %v2331_v0 = vadd.f32 %v390_v62, %v375_v60 }
 0x4cb   :  { %1944 = vtanh.f32 %v2329_v61 }
 0x4cc   :  { %1946 = vtanh.f32 %v2331_v0 }
 0x4d5   :  { %v1943_v31 = vpop.eup %1942 }
 0x4d6   :  { %403 = vrot.lane.b32.xlu1 %v1943_v31, %s2153_s0 }
 0x4d8   :  { %v1945_v34 = vpop.eup %1944 }
 0x4d9   :  { %v1947_v1 = vpop.eup %1946  ;;  %343 = vrot.lane.b32.xlu0 %v1945_v34, %s2153_s0 }
 0x4da   :  { %401 = vrot.lane.b32.xlu1 %v1947_v1, %s2153_s0 }
 0x548   :  { %v404_v2 = vpop.permute.xlu1 %403 }
 0x549   :  { %v408_v3 = vmul.f32 %v1937_v19, %v404_v2 }
 0x54b   :  { %v344_v6 = vpop.permute.xlu0 %343  ;;  %v411_v11 = vrot.slane %v408_v3, 7 }
 0x54c   :  { %v346_v8 = vmul.f32 %v1941_v22, %v344_v6  ;;  %v402_v9 = vpop.permute.xlu1 %401 }
 0x54d   :  { %v407_v12 = vmul.f32 %v1939_v21, %v402_v9 }
 0x54e   :  { %v418_v14 = vrot.slane %v346_v8, 7 }
 0x54f   :  { %v413_v15 = vsel %vm412_vm4, %v411_v11, %v407_v12  ;;  %v550_v11 = vrot.slane %v2326_v57, 7 }
 0x550   :  { %419 = vrot.lane.b32.xlu1 %v418_v14, %s2153_s0  ;;  %414 = vrot.lane.b32.xlu0 %v413_v15, %s2154_s2 }
 0x5c2   :  { %v420_v16 = vpop.permute.xlu1 %419  ;;  %v415_v7 = vpop.permute.xlu0 %414 }
 0x5c3   :  { %v422_v17 = vsel %vm244_vm2, %v415_v7, %v420_v16  ;;  %v549_v16 = vrot.slane %v2331_v0, 7 }
 0x5c4   :  { %v424_v18 = vrot.slane %v422_v17, 1 }
 0x5c6   :  { %1781 = vmatmul.mubr.msk.f32.vlgmr.msra.gmra.mxu1 %vm246_vm3, %v424_v18 }
 0x5c7   :  { %622 = vmatpush1.msra.mxu1 %v2221_v36  ;;  %669 = vmatprep.mubr.f32.mxu1 %v2155_v53 }
 0x5c8   :  { %623 = vmatprep.subr.mxu1 %v2223_v37 }
 0x5c9   :  { %624 = vmatpush1.msra.mxu1 %v2226_v38 }
 0x5ca   :  { %625 = vmatprep.subr.mxu1 %v2230_v39 }
 0x5cb   :  { %626 = vmatpush1.msra.mxu1 %v2234_v40 }
 0x5cc   :  { %627 = vmatprep.subr.mxu1 %v2238_v41 }
 0x5cd   :  { %628 = vmatpush1.msra.mxu1 %v2242_v43 }
 0x5ce   :  { %629 = vmatprep.subr.mxu1 %v2247_v44 }
 0x5cf   :  { %630 = vmatpush1.msra.mxu1 %v2250_v45 }
 0x5d0   :  { %631 = vmatprep.subr.mxu1 %v2254_v46 }
 0x5d1   :  { %632 = vmatpush1.msra.mxu1 %v2258_v48 }
 0x5d2   :  { %633 = vmatprep.subr.mxu1 %v2263_v49 }
 0x5d3   :  { %634 = vmatpush1.msra.mxu1 %v2266_v50 }
 0x5d4   :  { %635 = vmatprep.subr.mxu1 %v2270_v51 }
 0x5d5   :  { %636 = vmatpush1.msra.mxu1 %v2281_v52 }
 0x5d6   :  { %977 = vmatprep.subr.mxu1 %v2219_v35 }
 0x686   :  { %v493_v19 = vpop.f32.mrf.mxu1 }
 0x687   :  { %v525_v20 = vrot.slane %v493_v19, 6  ;;  %v526_v21 = vrot.slane %v493_v19, 7 }
 0x688   :  { %v495_v22 = vpop.f32.mrf.mxu1 }
 0x689   :  { %v529_v23 = vadd.f32 %v525_v20, %v2196_v13  ;;  %v530_v24 = vadd.f32 %v526_v21, %v2193_v10  ;;  %v498_v25 = vadd.f32 %v495_v22, %v2313_v63 }
 0x68b   :  { %v1784_v26 = vmul.f32 -1.442695, %v529_v23  ;;  %v1785_v27 = vmul.f32 -1.442695, %v530_v24  ;;  %v1782_v28 = vmul.f32 -1.442695, %v498_v25 }
 0x68d   :  { %1948 = vpow2.f32 %v1784_v26 }
 0x68e   :  { %1950 = vpow2.f32 %v1785_v27 }
 0x68f   :  { %1952 = vpow2.f32 %v1782_v28 }
 0x69a   :  { %v1949_v29 = vpop.eup %1948 }
 0x69b   :  { %v1951_v30 = vpop.eup %1950  ;;  %v537_v32 = vadd.f32 1.0, %v1949_v29 }
 0x69c   :  { %v1953_v33 = vpop.eup %1952  ;;  %v538_v42 = vadd.f32 1.0, %v1951_v30 }
 0x69d   :  { %1954 = vrcp.f32 %v537_v32  ;;  %v502_v47 = vadd.f32 1.0, %v1953_v33 }
 0x69e   :  { %1956 = vrcp.f32 %v538_v42 }
 0x69f   :  { %1958 = vrcp.f32 %v502_v47 }
 0x6aa   :  { %v1955_v54 = vpop.eup %1954 }
 0x6ab   :  { %v1957_v55 = vpop.eup %1956  ;;  %v543_v62 = vmul.f32 2.0, %v1955_v54  ;;  %v553_v19 = vmul.f32 %v1955_v54, %v549_v16 }
 0x6ac   :  { %v1959_v56 = vpop.eup %1958  ;;  %v544_v58 = vmul.f32 2.0, %v1957_v55  ;;  %v554_v12 = vmul.f32 %v1957_v55, %v550_v11 }
 0x6ad   :  { %v505_v59 = vmul.f32 2.0, %v1959_v56  ;;  %v1786_v34 = vadd.f32 -1.0, %v543_v62  ;;  %v507_v14 = vmul.f32 %v1959_v56, %v2329_v61 }
 0x6ae   :  { %v1787_v60 = vadd.f32 -1.0, %v544_v58 }
 0x6af   :  { %v1783_v31 = vadd.f32 -1.0, %v505_v59 }
 0x6b0   :  { %559 = vrot.lane.b32.xlu0 %v1787_v60, %s2153_s0 }
 0x6b1   :  { %509 = vrot.lane.b32.xlu1 %v1783_v31, %s2153_s0 }
 0x6b4   :  { %557 = vrot.lane.b32.xlu0 %v1786_v34, %s2153_s0 }
 0x722   :  { %v560_v1 = vpop.permute.xlu0 %559 }
 0x723   :  { %v564_v2 = vmul.f32 %v1957_v55, %v560_v1  ;;  %v510_v3 = vpop.permute.xlu1 %509 }
 0x724   :  { %v512_v6 = vmul.f32 %v1959_v56, %v510_v3 }
 0x725   :  { %569 = vrot.lane.b32.xlu1 %v564_v2, %s2154_s2 }
 0x726   :  { %514 = vrot.lane.b32.xlu0 %v512_v6, %s2154_s2  ;;  %v558_v8 = vpop.permute.xlu0 %557 }
 0x727   :  { %v563_v9 = vmul.f32 %v1955_v54, %v558_v8 }
 0x729   :  { %567 = vrot.lane.b32.xlu1 %v563_v9, %s2154_s2 }
 0x797   :  { %v570_v15 = vpop.permute.xlu1 %569 }
 0x798   :  { %v515_v7 = vpop.permute.xlu0 %514  ;;  %v2371_v17 = vadd.f32 %v570_v15, %v554_v12 }
 0x799   :  { %v2373_v18 = vadd.f32 %v515_v7, %v507_v14 }
 0x79a   :  { %1960 = vtanh.f32 %v2371_v17 }
 0x79b   :  { %1962 = vtanh.f32 %v2373_v18  ;;  %v568_v20 = vpop.permute.xlu1 %567 }
 0x79c   :  { %v2377_v21 = vadd.f32 %v568_v20, %v553_v19 }
 0x79e   :  { %1964 = vtanh.f32 %v2377_v21 }
 0x7a7   :  { %v1961_v57 = vpop.eup %1960 }
 0x7a8   :  { %v1963_v61 = vpop.eup %1962  ;;  %581 = vrot.lane.b32.xlu0 %v1961_v57, %s2153_s0 }
 0x7a9   :  { %520 = vrot.lane.b32.xlu1 %v1963_v61, %s2153_s0 }
 0x7ab   :  { %v1965_v0 = vpop.eup %1964 }
 0x7ac   :  { %579 = vrot.lane.b32.xlu0 %v1965_v0, %s2153_s0 }
 0x81a   :  { %v582_v22 = vpop.permute.xlu0 %581 }
 0x81b   :  { %v586_v23 = vmul.f32 %v1957_v55, %v582_v22  ;;  %v521_v24 = vpop.permute.xlu1 %520 }
 0x81c   :  { %v523_v25 = vmul.f32 %v1959_v56, %v521_v24 }
 0x81d   :  { %v589_v28 = vrot.slane %v586_v23, 7 }
 0x81e   :  { %v596_v26 = vrot.slane %v523_v25, 6  ;;  %v580_v27 = vpop.permute.xlu0 %579 }
 0x81f   :  { %v585_v29 = vmul.f32 %v1955_v54, %v580_v27  ;;  %v728_v27 = vrot.slane %v2371_v17, 7 }
 0x820   :  { %597 = vrot.lane.b32.xlu0 %v596_v26, %s2153_s0 }
 0x821   :  { %v591_v30 = vsel %vm590_vm5, %v589_v28, %v585_v29 }
 0x822   :  { %592 = vrot.lane.b32.xlu1 %v591_v30, %s2154_s2 }
 0x892   :  { %v598_v32 = vpop.permute.xlu0 %597 }
 0x894   :  { %v593_v33 = vpop.permute.xlu1 %592 }
 0x895   :  { %v600_v42 = vsel %vm244_vm2, %v593_v33, %v598_v32  ;;  %v727_v32 = vrot.slane %v2377_v21, 7 }
 0x896   :  { %v602_v47 = vrot.slane %v600_v42, 2 }
 0x898   :  { %1788 = vmatmul.mubr.msk.f32.vlgmr.msra.gmra.mxu1 %vm246_vm3, %v602_v47 }
 0x899   :  { %978 = vmatpush1.msra.mxu1 %v2221_v36  ;;  %1025 = vmatprep.mubr.f32.mxu1 %v2155_v53 }
 0x89a   :  { %979 = vmatprep.subr.mxu1 %v2223_v37 }
 0x89b   :  { %980 = vmatpush1.msra.mxu1 %v2226_v38 }
 0x89c   :  { %981 = vmatprep.subr.mxu1 %v2230_v39 }
 0x89d   :  { %982 = vmatpush1.msra.mxu1 %v2234_v40 }
 0x89e   :  { %983 = vmatprep.subr.mxu1 %v2238_v41 }
 0x89f   :  { %984 = vmatpush1.msra.mxu1 %v2242_v43 }
 0x8a0   :  { %985 = vmatprep.subr.mxu1 %v2247_v44 }
 0x8a1   :  { %986 = vmatpush1.msra.mxu1 %v2250_v45 }
 0x8a2   :  { %987 = vmatprep.subr.mxu1 %v2254_v46 }
 0x8a3   :  { %988 = vmatpush1.msra.mxu1 %v2258_v48 }
 0x8a4   :  { %989 = vmatprep.subr.mxu1 %v2263_v49 }
 0x8a5   :  { %990 = vmatpush1.msra.mxu1 %v2266_v50 }
 0x8a6   :  { %991 = vmatprep.subr.mxu1 %v2270_v51 }
 0x8a7   :  { %992 = vmatpush1.msra.mxu1 %v2281_v52 }
 0x8a8   :  { %1333 = vmatprep.subr.mxu1 %v2219_v35 }
 0x958   :  { %v671_v54 = vpop.f32.mrf.mxu1 }
 0x959   :  { %v703_v55 = vrot.slane %v671_v54, 5  ;;  %v704_v56 = vrot.slane %v671_v54, 6 }
 0x95a   :  { %v673_v58 = vpop.f32.mrf.mxu1 }
 0x95b   :  { %v707_v59 = vadd.f32 %v703_v55, %v2196_v13  ;;  %v708_v60 = vadd.f32 %v704_v56, %v2193_v10  ;;  %v676_v62 = vadd.f32 %v673_v58, %v2313_v63 }
 0x95d   :  { %v1791_v31 = vmul.f32 -1.442695, %v707_v59  ;;  %v1792_v34 = vmul.f32 -1.442695, %v708_v60  ;;  %v1789_v1 = vmul.f32 -1.442695, %v676_v62 }
 0x95f   :  { %1966 = vpow2.f32 %v1791_v31 }
 0x960   :  { %1968 = vpow2.f32 %v1792_v34 }
 0x961   :  { %1970 = vpow2.f32 %v1789_v1 }
 0x96c   :  { %v1967_v2 = vpop.eup %1966 }
 0x96d   :  { %v1969_v3 = vpop.eup %1968  ;;  %v715_v6 = vadd.f32 1.0, %v1967_v2 }
 0x96e   :  { %v1971_v8 = vpop.eup %1970  ;;  %v716_v9 = vadd.f32 1.0, %v1969_v3 }
 0x96f   :  { %1972 = vrcp.f32 %v715_v6  ;;  %v680_v11 = vadd.f32 1.0, %v1971_v8 }
 0x970   :  { %1974 = vrcp.f32 %v716_v9 }
 0x971   :  { %1976 = vrcp.f32 %v680_v11 }
 0x97c   :  { %v1973_v12 = vpop.eup %1972 }
 0x97d   :  { %v1975_v14 = vpop.eup %1974  ;;  %v721_v20 = vmul.f32 2.0, %v1973_v12  ;;  %v731_v54 = vmul.f32 %v1973_v12, %v727_v32 }
 0x97e   :  { %v1977_v15 = vpop.eup %1976  ;;  %v722_v16 = vmul.f32 2.0, %v1975_v14  ;;  %v732_v28 = vmul.f32 %v1975_v14, %v728_v27 }
 0x97f   :  { %v683_v7 = vmul.f32 2.0, %v1977_v15  ;;  %v1793_v61 = vadd.f32 -1.0, %v721_v20  ;;  %v685_v29 = vmul.f32 %v1977_v15, %v2373_v18 }
 0x980   :  { %v1794_v19 = vadd.f32 -1.0, %v722_v16 }
 0x981   :  { %v1790_v57 = vadd.f32 -1.0, %v683_v7 }
 0x982   :  { %737 = vrot.lane.b32.xlu1 %v1794_v19, %s2153_s0 }
 0x983   :  { %687 = vrot.lane.b32.xlu0 %v1790_v57, %s2153_s0 }
 0x986   :  { %735 = vrot.lane.b32.xlu1 %v1793_v61, %s2153_s0 }
 0x9f4   :  { %v738_v0 = vpop.permute.xlu1 %737 }
 0x9f5   :  { %v742_v22 = vmul.f32 %v1975_v14, %v738_v0  ;;  %v688_v23 = vpop.permute.xlu0 %687 }
 0x9f6   :  { %v690_v24 = vmul.f32 %v1977_v15, %v688_v23 }
 0x9f7   :  { %747 = vrot.lane.b32.xlu0 %v742_v22, %s2154_s2 }
 0x9f8   :  { %692 = vrot.lane.b32.xlu1 %v690_v24, %s2154_s2  ;;  %v736_v25 = vpop.permute.xlu1 %735 }
 0x9f9   :  { %v741_v26 = vmul.f32 %v1973_v12, %v736_v25 }
 0x9fb   :  { %745 = vrot.lane.b32.xlu0 %v741_v26, %s2154_s2 }
 0xa69   :  { %v748_v30 = vpop.permute.xlu0 %747 }
 0xa6a   :  { %v693_v33 = vpop.permute.xlu1 %692  ;;  %v2416_v42 = vadd.f32 %v748_v30, %v732_v28 }
 0xa6b   :  { %v2418_v47 = vadd.f32 %v693_v33, %v685_v29 }
 0xa6c   :  { %1978 = vtanh.f32 %v2416_v42 }
 0xa6d   :  { %1980 = vtanh.f32 %v2418_v47  ;;  %v746_v55 = vpop.permute.xlu0 %745 }
 0xa6e   :  { %v2422_v56 = vadd.f32 %v746_v55, %v731_v54 }
 0xa70   :  { %1982 = vtanh.f32 %v2422_v56 }
 0xa79   :  { %v1979_v17 = vpop.eup %1978 }
 0xa7a   :  { %v1981_v18 = vpop.eup %1980  ;;  %759 = vrot.lane.b32.xlu1 %v1979_v17, %s2153_s0 }
 0xa7b   :  { %698 = vrot.lane.b32.xlu0 %v1981_v18, %s2153_s0 }
 0xa7d   :  { %v1983_v21 = vpop.eup %1982 }
 0xa7e   :  { %757 = vrot.lane.b32.xlu1 %v1983_v21, %s2153_s0 }
 0xaec   :  { %v760_v58 = vpop.permute.xlu1 %759 }
 0xaed   :  { %v764_v59 = vmul.f32 %v1975_v14, %v760_v58  ;;  %v699_v60 = vpop.permute.xlu0 %698 }
 0xaee   :  { %v701_v62 = vmul.f32 %v1977_v15, %v699_v60 }
 0xaef   :  { %v767_v1 = vrot.slane %v764_v59, 7 }
 0xaf0   :  { %v774_v31 = vrot.slane %v701_v62, 5  ;;  %v758_v34 = vpop.permute.xlu1 %757 }
 0xaf1   :  { %v763_v2 = vmul.f32 %v1973_v12, %v758_v34 }
 0xaf2   :  { %775 = vrot.lane.b32.xlu1 %v774_v31, %s2153_s0  ;;  %v906_v31 = vrot.slane %v2416_v42, 7 }
 0xaf3   :  { %v769_v3 = vsel %vm768_vm6, %v767_v1, %v763_v2 }
 0xaf4   :  { %770 = vrot.lane.b32.xlu0 %v769_v3, %s2154_s2  ;;  %v905_v3 = vrot.slane %v2422_v56, 7 }
 0xb64   :  { %v776_v6 = vpop.permute.xlu1 %775 }
 0xb66   :  { %v771_v8 = vpop.permute.xlu0 %770 }
 0xb67   :  { %v778_v9 = vsel %vm244_vm2, %v771_v8, %v776_v6 }
 0xb68   :  { %v780_v11 = vrot.slane %v778_v9, 3 }
 0xb6a   :  { %1795 = vmatmul.mubr.msk.f32.vlgmr.msra.gmra.mxu0 %vm246_vm3, %v780_v11 }
 0xb6b   :  { %1156 = vmatpush1.msra.mxu0 %v2221_v36  ;;  %1203 = vmatprep.mubr.f32.mxu0 %v2155_v53 }
 0xb6c   :  { %1157 = vmatprep.subr.mxu0 %v2223_v37 }
 0xb6d   :  { %1158 = vmatpush1.msra.mxu0 %v2226_v38 }
 0xb6e   :  { %1159 = vmatprep.subr.mxu0 %v2230_v39 }
 0xb6f   :  { %1160 = vmatpush1.msra.mxu0 %v2234_v40 }
 0xb70   :  { %1161 = vmatprep.subr.mxu0 %v2238_v41 }
 0xb71   :  { %1162 = vmatpush1.msra.mxu0 %v2242_v43 }
 0xb72   :  { %1163 = vmatprep.subr.mxu0 %v2247_v44 }
 0xb73   :  { %1164 = vmatpush1.msra.mxu0 %v2250_v45 }
 0xb74   :  { %1165 = vmatprep.subr.mxu0 %v2254_v46 }
 0xb75   :  { %1166 = vmatpush1.msra.mxu0 %v2258_v48 }
 0xb76   :  { %1167 = vmatprep.subr.mxu0 %v2263_v49 }
 0xb77   :  { %1168 = vmatpush1.msra.mxu0 %v2266_v50 }
 0xb78   :  { %1169 = vmatprep.subr.mxu0 %v2270_v51 }
 0xb79   :  { %1170 = vmatpush1.msra.mxu0 %v2281_v52 }
 0xb7a   :  { %1517 = vmatprep.subr.mxu0 %v2219_v35 }
 0xc2a   :  { %v849_v12 = vpop.f32.mrf.mxu0 }
 0xc2b   :  { %v881_v14 = vrot.slane %v849_v12, 4  ;;  %v882_v15 = vrot.slane %v849_v12, 5 }
 0xc2c   :  { %v851_v16 = vpop.f32.mrf.mxu0 }
 0xc2d   :  { %v885_v7 = vadd.f32 %v881_v14, %v2196_v13  ;;  %v886_v19 = vadd.f32 %v882_v15, %v2193_v10  ;;  %v854_v20 = vadd.f32 %v851_v16, %v2313_v63 }
 0xc2f   :  { %v1798_v57 = vmul.f32 -1.442695, %v885_v7  ;;  %v1799_v61 = vmul.f32 -1.442695, %v886_v19  ;;  %v1796_v0 = vmul.f32 -1.442695, %v854_v20 }
 0xc31   :  { %1984 = vpow2.f32 %v1798_v57 }
 0xc32   :  { %1986 = vpow2.f32 %v1799_v61 }
 0xc33   :  { %1988 = vpow2.f32 %v1796_v0 }
 0xc3e   :  { %v1985_v22 = vpop.eup %1984 }
 0xc3f   :  { %v1987_v23 = vpop.eup %1986  ;;  %v893_v24 = vadd.f32 1.0, %v1985_v22 }
 0xc40   :  { %v1989_v35 = vpop.eup %1988  ;;  %v894_v25 = vadd.f32 1.0, %v1987_v23 }
 0xc41   :  { %1990 = vrcp.f32 %v893_v24  ;;  %v858_v26 = vadd.f32 1.0, %v1989_v35 }
 0xc42   :  { %1992 = vrcp.f32 %v894_v25 }
 0xc43   :  { %1994 = vrcp.f32 %v858_v26 }
 0xc4e   :  { %v1991_v27 = vpop.eup %1990 }
 0xc4f   :  { %v1993_v28 = vpop.eup %1992  ;;  %v899_v54 = vmul.f32 2.0, %v1991_v27  ;;  %v909_v11 = vmul.f32 %v1991_v27, %v905_v3 }
 0xc50   :  { %v1995_v29 = vpop.eup %1994  ;;  %v900_v30 = vmul.f32 2.0, %v1993_v28  ;;  %v910_v34 = vmul.f32 %v1993_v28, %v906_v31 }
 0xc51   :  { %v861_v32 = vmul.f32 2.0, %v1995_v29  ;;  %v1800_v17 = vadd.f32 -1.0, %v899_v54  ;;  %v863_v1 = vmul.f32 %v1995_v29, %v2418_v47 }
 0xc52   :  { %v1801_v33 = vadd.f32 -1.0, %v900_v30 }
 0xc53   :  { %v1797_v55 = vadd.f32 -1.0, %v861_v32 }
 0xc54   :  { %915 = vrot.lane.b32.xlu0 %v1801_v33, %s2153_s0 }
 0xc55   :  { %865 = vrot.lane.b32.xlu1 %v1797_v55, %s2153_s0 }
 0xc58   :  { %913 = vrot.lane.b32.xlu0 %v1800_v17, %s2153_s0 }
 0xcc6   :  { %v916_v18 = vpop.permute.xlu0 %915 }
 0xcc7   :  { %v920_v21 = vmul.f32 %v1993_v28, %v916_v18  ;;  %v866_v58 = vpop.permute.xlu1 %865 }
 0xcc8   :  { %v868_v59 = vmul.f32 %v1995_v29, %v866_v58 }
 0xcc9   :  { %925 = vrot.lane.b32.xlu1 %v920_v21, %s2154_s2 }
 0xcca   :  { %870 = vrot.lane.b32.xlu0 %v868_v59, %s2154_s2  ;;  %v914_v60 = vpop.permute.xlu0 %913 }
 0xccb   :  { %v919_v62 = vmul.f32 %v1991_v27, %v914_v60 }
 0xccd   :  { %923 = vrot.lane.b32.xlu1 %v919_v62, %s2154_s2 }
 0xd3b   :  { %v926_v2 = vpop.permute.xlu1 %925 }
 0xd3c   :  { %v871_v6 = vpop.permute.xlu0 %870  ;;  %v2461_v8 = vadd.f32 %v926_v2, %v910_v34 }
 0xd3d   :  { %v2463_v9 = vadd.f32 %v871_v6, %v863_v1 }
 0xd3e   :  { %1996 = vtanh.f32 %v2461_v8  ;;  %v1084_v31 = vrot.slane %v2461_v8, 7 }
 0xd3f   :  { %1998 = vtanh.f32 %v2463_v9  ;;  %v924_v12 = vpop.permute.xlu1 %923 }
 0xd40   :  { %v2467_v14 = vadd.f32 %v924_v12, %v909_v11 }
 0xd42   :  { %2000 = vtanh.f32 %v2467_v14  ;;  %v1083_v3 = vrot.slane %v2467_v14, 7 }
 0xd4b   :  { %v1997_v42 = vpop.eup %1996 }
 0xd4c   :  { %v1999_v47 = vpop.eup %1998  ;;  %937 = vrot.lane.b32.xlu0 %v1997_v42, %s2153_s0 }
 0xd4d   :  { %876 = vrot.lane.b32.xlu1 %v1999_v47, %s2153_s0 }
 0xd4f   :  { %v2001_v56 = vpop.eup %2000 }
 0xd50   :  { %935 = vrot.lane.b32.xlu0 %v2001_v56, %s2153_s0 }
 0xdbe   :  { %v938_v15 = vpop.permute.xlu0 %937 }
 0xdbf   :  { %v942_v16 = vmul.f32 %v1993_v28, %v938_v15  ;;  %v877_v7 = vpop.permute.xlu1 %876 }
 0xdc0   :  { %v879_v19 = vmul.f32 %v1995_v29, %v877_v7 }
 0xdc1   :  { %v945_v61 = vrot.slane %v942_v16, 7 }
 0xdc2   :  { %v952_v20 = vrot.slane %v879_v19, 4  ;;  %v936_v57 = vpop.permute.xlu0 %935 }
 0xdc3   :  { %v941_v0 = vmul.f32 %v1991_v27, %v936_v57 }
 0xdc4   :  { %953 = vrot.lane.b32.xlu0 %v952_v20, %s2153_s0 }
 0xdc5   :  { %v947_v22 = vsel %vm946_vm7, %v945_v61, %v941_v0 }
 0xdc6   :  { %948 = vrot.lane.b32.xlu1 %v947_v22, %s2154_s2 }
 0xe36   :  { %v954_v23 = vpop.permute.xlu0 %953 }
 0xe38   :  { %v949_v24 = vpop.permute.xlu1 %948 }
 0xe39   :  { %v956_v35 = vsel %vm244_vm2, %v949_v24, %v954_v23 }
 0xe3a   :  { %v958_v25 = vrot.slane %v956_v35, 4 }
 0xe3c   :  { %1802 = vmatmul.mubr.msk.f32.vlgmr.msra.gmra.mxu1 %vm246_vm3, %v958_v25 }
 0xe3d   :  { %1334 = vmatpush1.msra.mxu1 %v2221_v36  ;;  %1381 = vmatprep.mubr.f32.mxu1 %v2155_v53 }
 0xe3e   :  { %1335 = vmatprep.subr.mxu1 %v2223_v37 }
 0xe3f   :  { %1336 = vmatpush1.msra.mxu1 %v2226_v38 }
 0xe40   :  { %1337 = vmatprep.subr.mxu1 %v2230_v39 }
 0xe41   :  { %1338 = vmatpush1.msra.mxu1 %v2234_v40 }
 0xe42   :  { %1339 = vmatprep.subr.mxu1 %v2238_v41 }
 0xe43   :  { %1340 = vmatpush1.msra.mxu1 %v2242_v43 }
 0xe44   :  { %1341 = vmatprep.subr.mxu1 %v2247_v44 }
 0xe45   :  { %1342 = vmatpush1.msra.mxu1 %v2250_v45 }
 0xe46   :  { %1343 = vmatprep.subr.mxu1 %v2254_v46 }
 0xe47   :  { %1344 = vmatpush1.msra.mxu1 %v2258_v48 }
 0xe48   :  { %1345 = vmatprep.subr.mxu1 %v2263_v49 }
 0xe49   :  { %1346 = vmatpush1.msra.mxu1 %v2266_v50 }
 0xe4a   :  { %1347 = vmatprep.subr.mxu1 %v2270_v51 }
 0xe4b   :  { %1348 = vmatpush1.msra.mxu1 %v2281_v52 }
 0xe4c   :  { %1861 = vmatprep.subr.mxu1 %v2155_v53 }
 0xefc   :  { %v1027_v36 = vpop.f32.mrf.mxu1 }
 0xefd   :  { %v1059_v37 = vrot.slane %v1027_v36, 3  ;;  %v1060_v38 = vrot.slane %v1027_v36, 4  ;;  %v2066_v36 = vld [vmem:[#allocation6 + $0x70] sm:$0xff] }
 0xefe   :  { %v1029_v39 = vpop.f32.mrf.mxu1 }
 0xeff   :  { %v1063_v40 = vadd.f32 %v1059_v37, %v2196_v13  ;;  %v1064_v41 = vadd.f32 %v1060_v38, %v2193_v10  ;;  %v1032_v43 = vadd.f32 %v1029_v39, %v2313_v63  ;;  %v2067_v37 = vld [vmem:[#allocation6 + $0x68] sm:$0xff]  ;;  %v2068_v38 = vld [vmem:[#allocation6 + $0x60] sm:$0xff]  ;;  %v2069_v39 = vld [vmem:[#allocation6 + $0x58] sm:$0xff] }
 0xf01   :  { %v1805_v44 = vmul.f32 -1.442695, %v1063_v40  ;;  %v1806_v45 = vmul.f32 -1.442695, %v1064_v41  ;;  %v1803_v46 = vmul.f32 -1.442695, %v1032_v43 }
 0xf02   :  { %v2070_v40 = vld [vmem:[#allocation6 + $0x50] sm:$0xff]  ;;  %v2071_v41 = vld [vmem:[#allocation6 + $0x48] sm:$0xff]  ;;  %v2072_v43 = vld [vmem:[#allocation6 + $0x40] sm:$0xff] }
 0xf03   :  { %2002 = vpow2.f32 %v1805_v44  ;;  %v2073_v44 = vld [vmem:[#allocation6 + $0x38] sm:$0xff] }
 0xf04   :  { %2004 = vpow2.f32 %v1806_v45  ;;  %v2074_v45 = vld [vmem:[#allocation6 + $0x30] sm:$0xff] }
 0xf05   :  { %2006 = vpow2.f32 %v1803_v46  ;;  %v2075_v46 = vld [vmem:[#allocation6 + $0x28] sm:$0xff] }
 0xf10   :  { %v2003_v48 = vpop.eup %2002 }
 0xf11   :  { %v2005_v49 = vpop.eup %2004  ;;  %v1071_v50 = vadd.f32 1.0, %v2003_v48  ;;  %v2076_v48 = vld [vmem:[#allocation6 + $0x20] sm:$0xff] }
 0xf12   :  { %v2007_v51 = vpop.eup %2006  ;;  %v1072_v52 = vadd.f32 1.0, %v2005_v49  ;;  %v2077_v49 = vld [vmem:[#allocation6 + $0x18] sm:$0xff] }
 0xf13   :  { %2008 = vrcp.f32 %v1071_v50  ;;  %v1036_v26 = vadd.f32 1.0, %v2007_v51  ;;  %v2078_v50 = vld [vmem:[#allocation6 + $0x10] sm:$0xff]  ;;  %v2079_v51 = vld [vmem:[#allocation6 + $0x8] sm:$0xff] }
 0xf14   :  { %2010 = vrcp.f32 %v1072_v52  ;;  %v2080_v52 = vld [vmem:[#allocation6] sm:$0xff] }
 0xf15   :  { %2012 = vrcp.f32 %v1036_v26 }
 0xf20   :  { %v2009_v27 = vpop.eup %2008 }
 0xf21   :  { %v2011_v28 = vpop.eup %2010  ;;  %v1077_v54 = vmul.f32 2.0, %v2009_v27  ;;  %v1087_v42 = vmul.f32 %v2009_v27, %v1083_v3 }
 0xf22   :  { %v2013_v29 = vpop.eup %2012  ;;  %v1078_v30 = vmul.f32 2.0, %v2011_v28  ;;  %v1088_v34 = vmul.f32 %v2011_v28, %v1084_v31 }
 0xf23   :  { %v1039_v32 = vmul.f32 2.0, %v2013_v29  ;;  %v1807_v17 = vadd.f32 -1.0, %v1077_v54  ;;  %v1041_v1 = vmul.f32 %v2013_v29, %v2463_v9 }
 0xf24   :  { %v1808_v33 = vadd.f32 -1.0, %v1078_v30 }
 0xf25   :  { %v1804_v55 = vadd.f32 -1.0, %v1039_v32 }
 0xf26   :  { %1093 = vrot.lane.b32.xlu1 %v1808_v33, %s2153_s0 }
 0xf27   :  { %1043 = vrot.lane.b32.xlu0 %v1804_v55, %s2153_s0 }
 0xf2a   :  { %1091 = vrot.lane.b32.xlu1 %v1807_v17, %s2153_s0 }
 0xf98   :  { %v1094_v18 = vpop.permute.xlu1 %1093 }
 0xf99   :  { %v1098_v21 = vmul.f32 %v2011_v28, %v1094_v18  ;;  %v1044_v58 = vpop.permute.xlu0 %1043 }
 0xf9a   :  { %v1046_v59 = vmul.f32 %v2013_v29, %v1044_v58 }
 0xf9b   :  { %1103 = vrot.lane.b32.xlu0 %v1098_v21, %s2154_s2 }
 0xf9c   :  { %1048 = vrot.lane.b32.xlu1 %v1046_v59, %s2154_s2  ;;  %v1092_v60 = vpop.permute.xlu1 %1091 }
 0xf9d   :  { %v1097_v62 = vmul.f32 %v2009_v27, %v1092_v60 }
 0xf9f   :  { %1101 = vrot.lane.b32.xlu0 %v1097_v62, %s2154_s2 }
0x100d   :  { %v1104_v2 = vpop.permute.xlu0 %1103 }
0x100e   :  { %v1049_v6 = vpop.permute.xlu1 %1048  ;;  %v2506_v11 = vadd.f32 %v1104_v2, %v1088_v34 }
0x100f   :  { %v2508_v12 = vadd.f32 %v1049_v6, %v1041_v1 }
0x1010   :  { %2014 = vtanh.f32 %v2506_v11 }
0x1011   :  { %2016 = vtanh.f32 %v2508_v12  ;;  %v1102_v47 = vpop.permute.xlu0 %1101 }
0x1012   :  { %v2512_v56 = vadd.f32 %v1102_v47, %v1087_v42 }
0x1014   :  { %2018 = vtanh.f32 %v2512_v56 }
0x101d   :  { %v2015_v8 = vpop.eup %2014 }
0x101e   :  { %v2017_v9 = vpop.eup %2016  ;;  %1115 = vrot.lane.b32.xlu1 %v2015_v8, %s2153_s0 }
0x101f   :  { %1054 = vrot.lane.b32.xlu0 %v2017_v9, %s2153_s0 }
0x1021   :  { %v2019_v14 = vpop.eup %2018 }
0x1022   :  { %1113 = vrot.lane.b32.xlu1 %v2019_v14, %s2153_s0 }
0x1090   :  { %v1116_v15 = vpop.permute.xlu1 %1115 }
0x1091   :  { %v1120_v16 = vmul.f32 %v2011_v28, %v1116_v15  ;;  %v1055_v7 = vpop.permute.xlu0 %1054 }
0x1092   :  { %v1057_v19 = vmul.f32 %v2013_v29, %v1055_v7 }
0x1093   :  { %v1123_v61 = vrot.slane %v1120_v16, 7 }
0x1094   :  { %v1130_v20 = vrot.slane %v1057_v19, 3  ;;  %v1114_v57 = vpop.permute.xlu1 %1113 }
0x1095   :  { %v1119_v0 = vmul.f32 %v2009_v27, %v1114_v57 }
0x1096   :  { %1131 = vrot.lane.b32.xlu1 %v1130_v20, %s2153_s0  ;;  %v1262_v20 = vrot.slane %v2506_v11, 7 }
0x1097   :  { %v1125_v22 = vsel %vm1124_vm8, %v1123_v61, %v1119_v0 }
0x1098   :  { %1126 = vrot.lane.b32.xlu0 %v1125_v22, %s2154_s2  ;;  %v1261_v22 = vrot.slane %v2512_v56, 7 }
0x1108   :  { %v1132_v23 = vpop.permute.xlu1 %1131 }
0x110a   :  { %v1127_v24 = vpop.permute.xlu0 %1126 }
0x110b   :  { %v1134_v35 = vsel %vm244_vm2, %v1127_v24, %v1132_v23 }
0x110c   :  { %v1136_v25 = vrot.slane %v1134_v35, 5 }
0x110e   :  { %1809 = vmatmul.mubr.msk.f32.vlgmr.msra.gmra.mxu0 %vm246_vm3, %v1136_v25 }
0x110f   :  { %1518 = vmatpush1.msra.mxu0 %v2066_v36  ;;  %1565 = vmatprep.mubr.f32.mxu0 %v2155_v53 }
0x1110   :  { %1519 = vmatprep.subr.mxu0 %v2067_v37 }
0x1111   :  { %1520 = vmatpush1.msra.mxu0 %v2068_v38 }
0x1112   :  { %1521 = vmatprep.subr.mxu0 %v2069_v39 }
0x1113   :  { %1522 = vmatpush1.msra.mxu0 %v2070_v40 }
0x1114   :  { %1523 = vmatprep.subr.mxu0 %v2071_v41 }
0x1115   :  { %1524 = vmatpush1.msra.mxu0 %v2072_v43 }
0x1116   :  { %1525 = vmatprep.subr.mxu0 %v2073_v44 }
0x1117   :  { %1526 = vmatpush1.msra.mxu0 %v2074_v45 }
0x1118   :  { %1527 = vmatprep.subr.mxu0 %v2075_v46 }
0x1119   :  { %1528 = vmatpush1.msra.mxu0 %v2076_v48 }
0x111a   :  { %1529 = vmatprep.subr.mxu0 %v2077_v49 }
0x111b   :  { %1530 = vmatpush1.msra.mxu0 %v2078_v50 }
0x111c   :  { %1531 = vmatprep.subr.mxu0 %v2079_v51 }
0x111d   :  { %1532 = vmatpush1.msra.mxu0 %v2080_v52 }
0x111e   :  { %1872 = vmatprep.subr.mxu0 %v2155_v53 }
0x11ce   :  { %v1205_v26 = vpop.f32.mrf.mxu0 }
0x11cf   :  { %v1237_v27 = vrot.slane %v1205_v26, 2  ;;  %v1238_v28 = vrot.slane %v1205_v26, 3 }
0x11d0   :  { %v1207_v29 = vpop.f32.mrf.mxu0 }
0x11d1   :  { %v1241_v30 = vadd.f32 %v1237_v27, %v2196_v13  ;;  %v1242_v32 = vadd.f32 %v1238_v28, %v2193_v10  ;;  %v1210_v33 = vadd.f32 %v1207_v29, %v2313_v63 }
0x11d3   :  { %v1812_v54 = vmul.f32 -1.442695, %v1241_v30  ;;  %v1813_v55 = vmul.f32 -1.442695, %v1242_v32  ;;  %v1810_v17 = vmul.f32 -1.442695, %v1210_v33 }
0x11d5   :  { %2020 = vpow2.f32 %v1812_v54 }
0x11d6   :  { %2022 = vpow2.f32 %v1813_v55 }
0x11d7   :  { %2024 = vpow2.f32 %v1810_v17 }
0x11e2   :  { %v2021_v18 = vpop.eup %2020 }
0x11e3   :  { %v2023_v21 = vpop.eup %2022  ;;  %v1249_v58 = vadd.f32 1.0, %v2021_v18 }
0x11e4   :  { %v2025_v59 = vpop.eup %2024  ;;  %v1250_v60 = vadd.f32 1.0, %v2023_v21 }
0x11e5   :  { %2026 = vrcp.f32 %v1249_v58  ;;  %v1214_v62 = vadd.f32 1.0, %v2025_v59 }
0x11e6   :  { %2028 = vrcp.f32 %v1250_v60 }
0x11e7   :  { %2030 = vrcp.f32 %v1214_v62 }
0x11f2   :  { %v2027_v31 = vpop.eup %2026 }
0x11f3   :  { %v2029_v34 = vpop.eup %2028  ;;  %v1255_v42 = vmul.f32 2.0, %v2027_v31  ;;  %v1265_v25 = vmul.f32 %v2027_v31, %v1261_v22 }
0x11f4   :  { %v2031_v1 = vpop.eup %2030  ;;  %v1256_v2 = vmul.f32 2.0, %v2029_v34  ;;  %v1266_v57 = vmul.f32 %v2029_v34, %v1262_v20 }
0x11f5   :  { %v1217_v3 = vmul.f32 2.0, %v2031_v1  ;;  %v1814_v8 = vadd.f32 -1.0, %v1255_v42  ;;  %v1219_v61 = vmul.f32 %v2031_v1, %v2508_v12 }
0x11f6   :  { %v1815_v6 = vadd.f32 -1.0, %v1256_v2 }
0x11f7   :  { %v1811_v47 = vadd.f32 -1.0, %v1217_v3 }
0x11f8   :  { %1271 = vrot.lane.b32.xlu0 %v1815_v6, %s2153_s0 }
0x11f9   :  { %1221 = vrot.lane.b32.xlu1 %v1811_v47, %s2153_s0 }
0x11fc   :  { %1269 = vrot.lane.b32.xlu0 %v1814_v8, %s2153_s0 }
0x126a   :  { %v1272_v9 = vpop.permute.xlu0 %1271 }
0x126b   :  { %v1276_v14 = vmul.f32 %v2029_v34, %v1272_v9  ;;  %v1222_v15 = vpop.permute.xlu1 %1221 }
0x126c   :  { %v1224_v16 = vmul.f32 %v2031_v1, %v1222_v15 }
0x126d   :  { %1281 = vrot.lane.b32.xlu1 %v1276_v14, %s2154_s2 }
0x126e   :  { %1226 = vrot.lane.b32.xlu0 %v1224_v16, %s2154_s2  ;;  %v1270_v7 = vpop.permute.xlu0 %1269 }
0x126f   :  { %v1275_v19 = vmul.f32 %v2027_v31, %v1270_v7 }
0x1271   :  { %1279 = vrot.lane.b32.xlu1 %v1275_v19, %s2154_s2 }
0x12df   :  { %v1282_v0 = vpop.permute.xlu1 %1281 }
0x12e0   :  { %v1227_v23 = vpop.permute.xlu0 %1226  ;;  %v2536_v24 = vadd.f32 %v1282_v0, %v1266_v57 }
0x12e1   :  { %v2538_v35 = vadd.f32 %v1227_v23, %v1219_v61 }
0x12e2   :  { %2032 = vtanh.f32 %v2536_v24  ;;  %v1440_v7 = vrot.slane %v2536_v24, 7 }
0x12e3   :  { %2034 = vtanh.f32 %v2538_v35  ;;  %v1280_v36 = vpop.permute.xlu1 %1279 }
0x12e4   :  { %v2542_v37 = vadd.f32 %v1280_v36, %v1265_v25 }
0x12e6   :  { %2036 = vtanh.f32 %v2542_v37  ;;  %v1439_v22 = vrot.slane %v2542_v37, 7 }
0x12ef   :  { %v2033_v11 = vpop.eup %2032 }
0x12f0   :  { %v2035_v12 = vpop.eup %2034  ;;  %1293 = vrot.lane.b32.xlu0 %v2033_v11, %s2153_s0 }
0x12f1   :  { %1232 = vrot.lane.b32.xlu1 %v2035_v12, %s2153_s0 }
0x12f3   :  { %v2037_v56 = vpop.eup %2036 }
0x12f4   :  { %1291 = vrot.lane.b32.xlu0 %v2037_v56, %s2153_s0 }
0x1362   :  { %v1294_v38 = vpop.permute.xlu0 %1293 }
0x1363   :  { %v1298_v39 = vmul.f32 %v2029_v34, %v1294_v38  ;;  %v1233_v40 = vpop.permute.xlu1 %1232 }
0x1364   :  { %v1235_v41 = vmul.f32 %v2031_v1, %v1233_v40 }
0x1365   :  { %v1301_v45 = vrot.slane %v1298_v39, 7 }
0x1366   :  { %v1308_v43 = vrot.slane %v1235_v41, 2  ;;  %v1292_v44 = vpop.permute.xlu0 %1291 }
0x1367   :  { %v1297_v46 = vmul.f32 %v2027_v31, %v1292_v44 }
0x1368   :  { %1309 = vrot.lane.b32.xlu0 %v1308_v43, %s2153_s0 }
0x1369   :  { %v1303_v48 = vsel %vm1302_vm9, %v1301_v45, %v1297_v46 }
0x136a   :  { %1304 = vrot.lane.b32.xlu1 %v1303_v48, %s2154_s2 }
0x13da   :  { %v1310_v49 = vpop.permute.xlu0 %1309 }
0x13dc   :  { %v1305_v50 = vpop.permute.xlu1 %1304 }
0x13dd   :  { %v1312_v51 = vsel %vm244_vm2, %v1305_v50, %v1310_v49 }
0x13de   :  { %v1314_v52 = vrot.slane %v1312_v51, 6 }
0x13e0   :  { %1816 = vmatmul.mubr.msk.f32.vlgmr.msra.gmra.mxu1 %vm246_vm3, %v1314_v52 }
0x13e1   :  { %1869 = vmatprep.mubr.msk.f32.mxu1 %vm2156_vm11, %v2155_v53 }
0x14a0   :  { %v1383_v26 = vpop.f32.mrf.mxu1 }
0x14a1   :  { %v1415_v27 = vrot.slane %v1383_v26, 1  ;;  %v1416_v28 = vrot.slane %v1383_v26, 2 }
0x14a2   :  { %v1385_v29 = vpop.f32.mrf.mxu1 }
0x14a3   :  { %v1419_v30 = vadd.f32 %v1415_v27, %v2196_v13  ;;  %v1420_v32 = vadd.f32 %v1416_v28, %v2193_v10  ;;  %v1388_v33 = vadd.f32 %v1385_v29, %v2313_v63 }
0x14a5   :  { %v1819_v54 = vmul.f32 -1.442695, %v1419_v30  ;;  %v1820_v55 = vmul.f32 -1.442695, %v1420_v32  ;;  %v1817_v17 = vmul.f32 -1.442695, %v1388_v33 }
0x14a7   :  { %2038 = vpow2.f32 %v1819_v54 }
0x14a8   :  { %2040 = vpow2.f32 %v1820_v55 }
0x14a9   :  { %2042 = vpow2.f32 %v1817_v17 }
0x14b4   :  { %v2039_v18 = vpop.eup %2038 }
0x14b5   :  { %v2041_v21 = vpop.eup %2040  ;;  %v1427_v58 = vadd.f32 1.0, %v2039_v18 }
0x14b6   :  { %v2043_v59 = vpop.eup %2042  ;;  %v1428_v60 = vadd.f32 1.0, %v2041_v21 }
0x14b7   :  { %2044 = vrcp.f32 %v1427_v58  ;;  %v1392_v62 = vadd.f32 1.0, %v2043_v59 }
0x14b8   :  { %2046 = vrcp.f32 %v1428_v60 }
0x14b9   :  { %2048 = vrcp.f32 %v1392_v62  ;;  %v61_v62 = vld [vmem:[#allocation4 + $0x30] sm:$0xff] }
0x14ba   :  { %1862 = vmatpush3.msra.mxu1 %v61_v62 }
0x14bb   :  { %1863 = vmatprep.subr.mxu1 %v2155_v53 }
0x14c4   :  { %v2045_v13 = vpop.eup %2044 }
0x14c5   :  { %v2047_v31 = vpop.eup %2046  ;;  %v1433_v6 = vmul.f32 2.0, %v2045_v13  ;;  %v1443_v25 = vmul.f32 %v2045_v13, %v1439_v22  ;;  %v62_v22 = vld [vmem:[#allocation4 + $0x38] sm:$0xff] }
0x14c6   :  { %v2049_v10 = vpop.eup %2048  ;;  %v1434_v34 = vmul.f32 2.0, %v2047_v31  ;;  %v1444_v19 = vmul.f32 %v2047_v31, %v1440_v7  ;;  %v67_v7 = vld [vmem:[#allocation4 + $0x60] sm:$0xff] }
0x14c7   :  { %v1395_v1 = vmul.f32 2.0, %v2049_v10  ;;  %v1821_v42 = vadd.f32 -1.0, %v1433_v6  ;;  %v1397_v20 = vmul.f32 %v2049_v10, %v2538_v35  ;;  %v73_v6 = vld [vmem:[#allocation4 + $0x90] sm:$0xff] }
0x14c8   :  { %v1822_v2 = vadd.f32 -1.0, %v1434_v34  ;;  %v77_v34 = vld [vmem:[#allocation4 + $0xb0] sm:$0xff] }
0x14c9   :  { %v1818_v3 = vadd.f32 -1.0, %v1395_v1  ;;  %v76_v1 = vld [vmem:[#allocation4 + $0xa8] sm:$0xff] }
0x14ca   :  { %1449 = vrot.lane.b32.xlu0 %v1822_v2, %s2153_s0  ;;  %v75_v2 = vld [vmem:[#allocation4 + $0xa0] sm:$0xff] }
0x14cb   :  { %1399 = vrot.lane.b32.xlu1 %v1818_v3, %s2153_s0  ;;  %v74_v3 = vld [vmem:[#allocation4 + $0x98] sm:$0xff] }
0x14cf   :  { %1447 = vrot.lane.b32.xlu1 %v1821_v42, %s2153_s0  ;;  %v72_v42 = vld [vmem:[#allocation4 + $0x88] sm:$0xff] }
0x153c   :  { %v1450_v47 = vpop.permute.xlu0 %1449 }
0x153d   :  { %v1454_v8 = vmul.f32 %v2047_v31, %v1450_v47  ;;  %v1400_v9 = vpop.permute.xlu1 %1399 }
0x153e   :  { %v1402_v14 = vmul.f32 %v2049_v10, %v1400_v9 }
0x153f   :  { %1459 = vrot.lane.b32.xlu1 %v1454_v8, %s2154_s2  ;;  %v71_v8 = vld [vmem:[#allocation4 + $0x80] sm:$0xff] }
0x1540   :  { %1404 = vrot.lane.b32.xlu0 %v1402_v14, %s2154_s2  ;;  %v70_v14 = vld [vmem:[#allocation4 + $0x78] sm:$0xff] }
0x1541   :  { %v1448_v15 = vpop.permute.xlu1 %1447 }
0x1542   :  { %v1453_v16 = vmul.f32 %v2045_v13, %v1448_v15  ;;  %v69_v15 = vld [vmem:[#allocation4 + $0x70] sm:$0xff] }
0x1544   :  { %1457 = vrot.lane.b32.xlu0 %v1453_v16, %s2154_s2  ;;  %v68_v16 = vld [vmem:[#allocation4 + $0x68] sm:$0xff] }
0x15b1   :  { %v1460_v57 = vpop.permute.xlu1 %1459 }
0x15b2   :  { %v1405_v61 = vpop.permute.xlu0 %1404  ;;  %v1464_v0 = vadd.f32 %v1460_v57, %v1444_v19  ;;  %v66_v19 = vld [vmem:[#allocation4 + $0x58] sm:$0xff] }
0x15b3   :  { %v1407_v23 = vadd.f32 %v1405_v61, %v1397_v20  ;;  %v65_v20 = vld [vmem:[#allocation4 + $0x50] sm:$0xff]  ;;  %v64_v61 = vld [vmem:[#allocation4 + $0x48] sm:$0xff] }
0x15b4   :  { %2050 = vtanh.f32 %v1464_v0  ;;  %v63_v0 = vld [vmem:[#allocation4 + $0x40] sm:$0xff] }
0x15b5   :  { %2052 = vtanh.f32 %v1407_v23 }
0x15b6   :  { %v1458_v36 = vpop.permute.xlu0 %1457 }
0x15b7   :  { %v1463_v11 = vadd.f32 %v1458_v36, %v1443_v25  ;;  %v2081_v25 = vld [vmem:[#allocation4 + $0x10] sm:$0xff] }
0x15b9   :  { %2054 = vtanh.f32 %v1463_v11 }
0x15c1   :  { %v2051_v12 = vpop.eup %2050 }
0x15c2   :  { %v2053_v56 = vpop.eup %2052  ;;  %1471 = vrot.lane.b32.xlu0 %v2051_v12, %s2153_s0 }
0x15c3   :  { %1410 = vrot.lane.b32.xlu1 %v2053_v56, %s2153_s0 }
0x15c6   :  { %v2055_v24 = vpop.eup %2054 }
0x15c7   :  { %1469 = vrot.lane.b32.xlu1 %v2055_v24, %s2153_s0 }
0x1634   :  { %v1472_v35 = vpop.permute.xlu0 %1471 }
0x1635   :  { %v1476_v38 = vmul.f32 %v2047_v31, %v1472_v35  ;;  %v1411_v39 = vpop.permute.xlu1 %1410  ;;  %v58_v31 = vld [vmem:[#allocation4 + $0x18] sm:$0xff]  ;;  %v1679_v35 = vsub.s32 3, %v2187_v5 }
0x1636   :  { %v1413_v41 = vmul.f32 %v2049_v10, %v1411_v39 }
0x1637   :  { %v1479_v37 = vrot.slane %v1476_v38, 7  ;;  %v1680_v38 = vrot.slane %v2081_v25, %v1679_v35 }
0x1638   :  { %v1487_v44 = vrot.slane %v1413_v41, 1 }
0x1639   :  { %v1470_v40 = vpop.permute.xlu1 %1469  ;;  %1482 = vrot.lane.b32.xlu1 %v1479_v37, %s2154_s2 }
0x163a   :  { %v1475_v43 = vmul.f32 %v2045_v13, %v1470_v40  ;;  %v59_v13 = vld [vmem:[#allocation4 + $0x20] sm:$0xff] }
0x163c   :  { %1480 = vrot.lane.b32.xlu0 %v1475_v43, %s2154_s2 }
0x1640   :  { %1488 = vrot.lane.b32.xlu0 %v1487_v44, %s2153_s0  ;;  %v1752_v44 = vand.u32 127, %v96_v4 }
0x1642   :  { %vm1753_vm12 = vcmp.lt.s32.totalorder %v1752_v44, 4 }
0x16ab   :  { %v1483_v46 = vpop.permute.xlu1 %1482 }
0x16ae   :  { %v1481_v45 = vpop.permute.xlu0 %1480 }
0x16b2   :  { %v1489_v48 = vpop.permute.xlu0 %1488 }
0x16b3   :  { %v1491_v49 = vsel %vm244_vm2, %v1481_v45, %v1489_v48  ;;  %v1492_v50 = vsel %vm244_vm2, %v1483_v46, %v1489_v48 }
0x16b4   :  { %v1496_v51 = vrot.slane %v1491_v49, 7  ;;  %v1497_v52 = vrot.slane %v1492_v50, 7 }
0x16b6   :  { %v1498_v26 = vsel %vm1495_vm10, %v1496_v51, %v1497_v52 }
0x16b7   :  { %1823 = vmatmul.mubr.msk.f32.vlgmr.msra.gmra.mxu0 %vm246_vm3, %v1498_v26 }
0x16b8   :  { %1904 = vmatprep.mubr.msk.f32.mxu0 %vm2156_vm11, %v2155_v53  ;;  %1873 = vmatpush3.msra.mxu0 %v77_v34 }
0x16b9   :  { %1874 = vmatprep.subr.mxu0 %v2155_v53 }
0x16ba   :  { %1875 = vmatpush3.msra.mxu0 %v76_v1 }
0x16bb   :  { %1876 = vmatprep.subr.mxu0 %v2155_v53 }
0x16bc   :  { %1877 = vmatpush3.msra.mxu0 %v75_v2 }
0x16bd   :  { %1878 = vmatprep.subr.mxu0 %v2155_v53 }
0x16be   :  { %1879 = vmatpush3.msra.mxu0 %v74_v3 }
0x16bf   :  { %1880 = vmatprep.subr.mxu0 %v2155_v53 }
0x16c0   :  { %1881 = vmatpush3.msra.mxu0 %v73_v6 }
0x16c1   :  { %1882 = vmatprep.subr.mxu0 %v2155_v53 }
0x16c2   :  { %1883 = vmatpush3.msra.mxu0 %v72_v42 }
0x16c3   :  { %1884 = vmatprep.subr.mxu0 %v2155_v53 }
0x16c4   :  { %1885 = vmatpush3.msra.mxu0 %v71_v8 }
0x16c5   :  { %1886 = vmatprep.subr.mxu0 %v2155_v53 }
0x16c6   :  { %1887 = vmatpush3.msra.mxu0 %v70_v14 }
0x16c7   :  { %1888 = vmatprep.subr.mxu0 %v2155_v53 }
0x16c8   :  { %1889 = vmatpush3.msra.mxu0 %v69_v15 }
0x16c9   :  { %1890 = vmatprep.subr.mxu0 %v2155_v53 }
0x16ca   :  { %1891 = vmatpush3.msra.mxu0 %v68_v16 }
0x16cb   :  { %1892 = vmatprep.subr.mxu0 %v2155_v53 }
0x16cc   :  { %1893 = vmatpush3.msra.mxu0 %v67_v7 }
0x16cd   :  { %1894 = vmatprep.subr.mxu0 %v2155_v53 }
0x16ce   :  { %1895 = vmatpush3.msra.mxu0 %v66_v19 }
0x16cf   :  { %1896 = vmatprep.subr.mxu0 %v2155_v53 }
0x16d0   :  { %1897 = vmatpush3.msra.mxu0 %v65_v20 }
0x16d1   :  { %1898 = vmatprep.subr.mxu0 %v2155_v53 }
0x16d2   :  { %1899 = vmatpush3.msra.mxu0 %v64_v61 }
0x16d3   :  { %1900 = vmatprep.subr.mxu0 %v2155_v53 }
0x16d4   :  { %1901 = vmatpush3.msra.mxu0 %v63_v0 }
0x16d5   :  { %1902 = vmatprep.subr.mxu0 %v2155_v53 }
0x16d6   :  { %1903 = vmatpush3.msra.mxu0 %v62_v22 }
0x1777   :  { %v1567_v27 = vpop.f32.mrf.mxu0 }
0x1779   :  { %v1568_v28 = vpop.f32.mrf.mxu0 }
0x177a   :  { %v1571_v29 = vadd.f32 %v1568_v28, %v2313_v63  ;;  %v60_v63 = vld [vmem:[#allocation4 + $0x28] sm:$0xff] }
0x177b   :  { %1864 = vmatpush3.msra.mxu1 %v60_v63 }
0x177c   :  { %v1824_v30 = vmul.f32 -1.442695, %v1571_v29  ;;  %1865 = vmatprep.subr.mxu1 %v2155_v53 }
0x177d   :  { %1866 = vmatpush3.msra.mxu1 %v59_v13 }
0x177e   :  { %2056 = vpow2.f32 %v1824_v30  ;;  %1867 = vmatprep.subr.mxu1 %v2155_v53 }
0x177f   :  { %1868 = vmatpush3.msra.mxu1 %v58_v31 }
0x178b   :  { %v2057_v32 = vpop.eup %2056 }
0x178c   :  { %v1575_v33 = vadd.f32 1.0, %v2057_v32 }
0x178e   :  { %2058 = vrcp.f32 %v1575_v33 }
0x179b   :  { %v2059_v54 = vpop.eup %2058 }
0x179c   :  { %v1578_v55 = vmul.f32 2.0, %v2059_v54  ;;  %v1580_v58 = vmul.f32 %v2059_v54, %v1407_v23  ;;  %v1599_v23 = vsub.s32 2, %v2187_v5 }
0x179e   :  { %v1825_v17 = vadd.f32 -1.0, %v1578_v55  ;;  %v1600_v36 = vrot.slane %v2081_v25, %v1599_v23 }
0x17a0   :  { %1582 = vrot.lane.b32.xlu1 %v1825_v17, %s2153_s0 }
0x1812   :  { %v1583_v18 = vpop.permute.xlu1 %1582 }
0x1813   :  { %v1585_v21 = vmul.f32 %v2059_v54, %v1583_v18 }
0x1815   :  { %1587 = vrot.lane.b32.xlu0 %v1585_v21, %s2154_s2 }
0x1887   :  { %v1588_v59 = vpop.permute.xlu0 %1587 }
0x1888   :  { %v1590_v60 = vadd.f32 %v1588_v59, %v1580_v58 }
0x188a   :  { %2060 = vtanh.f32 %v1590_v60 }
0x1897   :  { %v2061_v10 = vpop.eup %2060 }
0x1898   :  { %1593 = vrot.lane.b32.xlu1 %v2061_v10, %s2153_s0 }
0x190a   :  { %v1594_v47 = vpop.permute.xlu1 %1593 }
0x190b   :  { %v1596_v9 = vmul.f32 %v2059_v54, %v1594_v47 }
0x190d   :  { %1602 = vrot.lane.b32.xlu0 %v1596_v9, %s2154_s2 }
0x197f   :  { %v1603_v57 = vpop.permute.xlu0 %1602 }
0x1980   :  { %1870 = vmatmul.mubr.msk.f32.vlgmr.msra.gmra.mxu1 %vm244_vm2, %v1603_v57 }
0x1a40   :  { %v1672_v11 = vpop.f32.mrf.mxu1 }
0x1a41   :  { %v1673_v12 = vadd.f32 %v1672_v11, %v1600_v36 }
0x1a42   :  { %v1871_v56 = vpop.f32.mrf.mxu1 }
0x1a43   :  { %v1676_v24 = vmax.f32 %v1673_v12, 0.0 }
0x1a45   :  { %1905 = vmatmul.mubr.f32.vlgmr.msra.gmra.mxu0 %v1676_v24 }
0x1b05   :  { %v1747_v39 = vpop.f32.mrf.mxu0 }
0x1b06   :  { %v1748_v37 = vadd.f32 %v1747_v39, %v1680_v38 }
0x1b07   :  { %v1906_v40 = vpop.f32.mrf.mxu0 }
0x1b08   :  { %v1827_v41 = vmul.f32 -1.442695, %v1748_v37 }
0x1b0a   :  { %2062 = vpow2.f32 %v1827_v41 }
0x1b17   :  { %v2063_v53 = vpop.eup %2062 }
0x1b18   :  { %v1757_v43 = vadd.f32 1.0, %v2063_v53 }
0x1b1a   :  { %2064 = vrcp.f32 %v1757_v43 }
0x1b27   :  { %v2065_v45 = vpop.eup %2064 }
0x1b28   :  { %v1760_v46 = vsel %vm1753_vm12, %v2065_v45, %v1748_v37 }
0x1b29   :  { %1761 = vst [vmem:[%s2608_s3] sm:$0x3] %v1760_v46 }
0x1b2a   :  { %1766 = vsyncpa [#allocation3], 1 }
0x1b2b   :  { %1767 = vsyncpa [#allocation5], 1 }

</bundles_post_ra>
